<compile_context>
chip_gen: v7x
topology: tpu7x:2x2x1
jax: 0.10.0
libtpu: 0.0.40
codegen_flags: <defaults>
</compile_context>

<pallas_src>
import functools

import jax
import jax.numpy as jnp
from jax.experimental import pallas as pl
from jax.experimental.pallas import tpu as pltpu

# ---- synthetic small T5-style encoder config ----
VOCAB = 100
D_MODEL = 32
N_HEADS = 4
D_KV = 8
D_INNER = N_HEADS * D_KV
D_FF = 64
N_LAYERS = 2
EPS = 1e-6
NEG_INF = -1e9


def _rmsnorm(x, gain):
    var = jnp.mean(x * x, axis=-1, keepdims=True)
    return x * jax.lax.rsqrt(var + EPS) * gain


def encoder_layer_kernel(h_ref, bias_ref, mask_ref, ln1_ref, wqkv_ref, wo_ref,
                         ln2_ref, wi_ref, wo2_ref, fln_ref, out_ref, acc_ref,
                         *, tp, seq_len):
    """One encoder layer for one block of TP passages (S = TP*L rows).

    Grid = (passage_block, layer).  The hidden tile lives in the f32 acc_ref
    scratch across the layer axis; only one layer's weights are in VMEM.
    """
    lyr = pl.program_id(1)
    n_layers = pl.num_programs(1)
    S = tp * seq_len

    @pl.when(lyr == 0)
    def _():
        acc_ref[...] = h_ref[...].astype(jnp.float32)   # (S, D_MODEL)

    h = acc_ref[...]                                    # f32 residual stream

    # --- self-attention sub-layer (pre-RMSNorm; T5 has no 1/sqrt(d) scale) ---
    hn = _rmsnorm(h, ln1_ref[0])                        # (S, D_MODEL)
    qkv = jnp.dot(hn.astype(jnp.bfloat16), wqkv_ref[0],
                  preferred_element_type=jnp.float32)   # one fused (S, 3*D_INNER) dot
    # passage dim becomes the batch dim of all attention matmuls
    qkv3 = qkv.reshape(tp, seq_len, 3 * D_INNER).astype(jnp.bfloat16)

    mask = mask_ref[0]                                  # (TP, 1, L) additive, f32

    ctx_heads = []
    for hd in range(N_HEADS):                           # static, matmuls are TP-batched
        q = qkv3[:, :, hd * D_KV:(hd + 1) * D_KV]
        k = qkv3[:, :, D_INNER + hd * D_KV:D_INNER + (hd + 1) * D_KV]
        v = qkv3[:, :, 2 * D_INNER + hd * D_KV:2 * D_INNER + (hd + 1) * D_KV]

        scores = jnp.einsum("pqd,pkd->pqk", q, k,
                            preferred_element_type=jnp.float32)   # (TP, L, L)
        # rel-pos bias is per-passage (broadcast over TP); padding mask in f32.
        scores = scores + bias_ref[hd][None] + mask

        scores = scores - jnp.max(scores, axis=-1, keepdims=True)
        p = jnp.exp(scores)
        p = p * pl.reciprocal(jnp.sum(p, axis=-1, keepdims=True), approx=True)

        ctx_heads.append(jnp.einsum("pqk,pkd->pqd", p.astype(jnp.bfloat16), v,
                                    preferred_element_type=jnp.float32))

    # concat heads -> single output projection with K = D_INNER (not N_HEADS x K=8)
    ctx = jnp.concatenate(ctx_heads, axis=-1).reshape(S, D_INNER)
    attn = jnp.dot(ctx.astype(jnp.bfloat16), wo_ref[0],
                   preferred_element_type=jnp.float32)
    h = h + attn

    # --- feed-forward sub-layer (ReLU, T5 default) ---
    hn2 = _rmsnorm(h, ln2_ref[0])
    ff = jnp.dot(hn2.astype(jnp.bfloat16), wi_ref[0],
                 preferred_element_type=jnp.float32)
    ff = jnp.maximum(ff, 0.0)
    h = h + jnp.dot(ff.astype(jnp.bfloat16), wo2_ref[0],
                    preferred_element_type=jnp.float32)

    acc_ref[...] = h

    @pl.when(lyr == n_layers - 1)
    def _():
        # final T5 RMSNorm fused into the same kernel; bf16 store halves DMA.
        out_ref[...] = _rmsnorm(h, fln_ref[...]).astype(out_ref.dtype)


def _choose_tp(bp, seq_len, d_model=D_MODEL, vmem_budget=48 * 1024 * 1024):
    """Passages-per-block: largest TP dividing BP whose per-block working set
    fits the VMEM budget.  Among fitting TPs prefer an even number of grid
    blocks (v7x has 2 TensorCores); on 1-TC parts (v5e/v6e) taking
    max(candidates) outright is equally valid."""
    def footprint(tp):
        s = tp * seq_len
        hid_io = 2 * 2 * s * d_model * 2                 # bf16 in/out, double-buffered
        acc = s * d_model * 4                            # f32 carry scratch
        scores = 2 * tp * seq_len * seq_len * 4          # score + prob tiles (f32)
        acts = s * 3 * D_INNER * 4 + s * D_INNER * 4 + s * D_FF * 4
        wts = 2 * 2 * (d_model * 3 * D_INNER + D_INNER * d_model
                       + d_model * D_FF + D_FF * d_model)  # 1 layer bf16, dbl-buffered
        bias = N_HEADS * seq_len * seq_len * 4
        return hid_io + acc + scores + acts + wts + bias

    candidates = [tp for tp in range(1, bp + 1)
                  if bp % tp == 0 and footprint(tp) <= vmem_budget]
    if not candidates:
        return 1
    even = [tp for tp in candidates if (bp // tp) % 2 == 0]
    pool = even if even else candidates
    return max(pool)


def run_encoder_stack(hidden, pos_bias, mask_bias, params, tp, seq_len,
                      vmem_limit_bytes=48 * 1024 * 1024):
    total, d_model = hidden.shape
    S = tp * seq_len
    nblk = total // S
    n_layers = params["wqkv"].shape[0]

    kernel = functools.partial(encoder_layer_kernel, tp=tp, seq_len=seq_len)

    # grid-constant blocks (loaded once)
    const = lambda shape: pl.BlockSpec(shape, lambda i, l, _n=len(shape): (0,) * _n)
    # per-layer stacked weights: only layer l is resident at grid step (i, l)
    per_layer = lambda shape: pl.BlockSpec(
        (1,) + shape[1:], lambda i, l, _n=len(shape): (l,) + (0,) * (_n - 1))

    return pl.pallas_call(
        kernel,
        out_shape=jax.ShapeDtypeStruct((total, d_model), jnp.bfloat16),
        grid=(nblk, n_layers),
        in_specs=[
            pl.BlockSpec((S, d_model), lambda i, l: (i, 0)),        # hidden (bf16), loaded once per block
            const(pos_bias.shape),                                  # (NH, L, L) rel-pos bias
            pl.BlockSpec((1, tp, 1, seq_len), lambda i, l: (i, 0, 0, 0)),  # padding-mask bias
            per_layer(params["ln1"].shape),
            per_layer(params["wqkv"].shape),
            per_layer(params["wo"].shape),
            per_layer(params["ln2"].shape),
            per_layer(params["wi"].shape),
            per_layer(params["wo2"].shape),
            const(params["final_ln"].shape),
        ],
        out_specs=pl.BlockSpec((S, d_model), lambda i, l: (i, 0)),  # VMEM-resident across layers
        scratch_shapes=[pltpu.VMEM((S, d_model), jnp.float32)],      # f32 residual carry
        compiler_params=pltpu.CompilerParams(
            dimension_semantics=("parallel", "arbitrary"),
            vmem_limit_bytes=vmem_limit_bytes,   # safe on v7x (64 MiB); can be raised on v5e/v6e
        ),
    )(hidden, pos_bias, mask_bias, params["ln1"], params["wqkv"], params["wo"],
      params["ln2"], params["wi"], params["wo2"], params["final_ln"])


def relative_position_bias(table, seq_len):
    # table: (N_HEADS, 2L-1) learned bias over clipped relative positions
    # TODO(synk): real T5 uses log-spaced relative-position bucketing; a simple
    # clipped relative-position table is used for this synthetic encoder.
    pos = jnp.arange(seq_len)
    rel = pos[None, :] - pos[:, None]
    idx = jnp.clip(rel, -(seq_len - 1), seq_len - 1) + (seq_len - 1)
    return table[:, idx]                          # (N_HEADS, L, L)


def init_params(key, seq_len):
    keys = jax.random.split(key, 6)
    s = 0.02
    nrm = lambda k, shape, dt=jnp.bfloat16: (
        s * jax.random.normal(k, shape, jnp.float32)).astype(dt)
    return {
        "embedding": nrm(keys[0], (VOCAB, D_MODEL), jnp.float32),
        "rel_bias": nrm(keys[1], (N_HEADS, 2 * seq_len - 1), jnp.float32),
        "final_ln": jnp.ones((1, D_MODEL), jnp.float32),
        # per-layer weights stacked along a leading layer axis (bf16 matmul weights)
        "ln1": jnp.ones((N_LAYERS, 1, D_MODEL), jnp.float32),
        "wqkv": nrm(keys[2], (N_LAYERS, D_MODEL, 3 * D_INNER)),
        "wo": nrm(keys[3], (N_LAYERS, D_INNER, D_MODEL)),
        "ln2": jnp.ones((N_LAYERS, 1, D_MODEL), jnp.float32),
        "wi": nrm(keys[4], (N_LAYERS, D_MODEL, D_FF)),
        "wo2": nrm(keys[5], (N_LAYERS, D_FF, D_MODEL)),
    }


def encoder_wrapper_forward(params, input_ids, attention_mask, passages_per_block=None):
    """EncoderWrapper.forward: (B, P, L) ids -> (B, P*L, d_model) last_hidden_state."""
    assert input_ids.ndim == 3
    B, P, L = input_ids.shape
    BP = B * P
    assert L % 8 == 0, "pad L so each passage is sublane-aligned"
    tp = _choose_tp(BP, L) if passages_per_block is None else passages_per_block
    assert BP % tp == 0
    nblk = BP // tp

    ids = input_ids.reshape(BP * L)
    # embedding gather stays in JAX (data-dependent gather); hidden piped as bf16
    hidden = params["embedding"][ids].astype(jnp.bfloat16)        # (BP*L, D_MODEL)

    # Small (NH, L, L) rel-pos bias shared by every passage; no (NH, S, S) tensor.
    pos_bias = relative_position_bias(params["rel_bias"], L)      # (NH, L, L) f32

    # Per-passage padding mask as an additive f32 bias, (nblk, TP, 1, L).
    mask_bias = ((1.0 - attention_mask.reshape(nblk, tp, 1, L).astype(jnp.float32))
                 * jnp.float32(NEG_INF))

    out = run_encoder_stack(hidden, pos_bias, mask_bias, params, tp, L)

    # FiD fusion: concatenate per-passage encodings along the sequence axis.
    # TODO(synk): padded query rows are not zeroed (same as the HF encoder).
    return out.reshape(B, P * L, D_MODEL)


if __name__ == "__main__":
    key = jax.random.PRNGKey(0)
    pkey, ikey = jax.random.split(key)
    B, P, L = 2, 3, 8
    params = init_params(pkey, L)

    input_ids = jax.random.randint(ikey, (B, P, L), 0, VOCAB, dtype=jnp.int32)
    # last two tokens of every passage are padding
    attention_mask = jnp.concatenate(
        [jnp.ones((B, P, L - 2), jnp.int32), jnp.zeros((B, P, 2), jnp.int32)], axis=-1)

    fwd = jax.jit(lambda ids, mask: encoder_wrapper_forward(params, ids, mask))
    out = fwd(input_ids, attention_mask)
    jax.block_until_ready(out)
    assert out.shape == (B, P * L, D_MODEL), out.shape
    assert bool(jnp.isfinite(out.astype(jnp.float32)).all())
    print("KERNEL_OK")
</pallas_src>

<mosaic_0001>
module attributes {stable_mosaic.version = 11 : i64} {
  func.func @encoder_layer_kernel(%arg0: i32, %arg1: i32, %arg2: memref<24x32xbf16, #tpu.memory_space<vmem>>, %arg3: memref<4x8x8xf32, #tpu.memory_space<vmem>>, %arg4: memref<1x3x1x8xf32, #tpu.memory_space<vmem>>, %arg5: memref<1x1x32xf32, #tpu.memory_space<vmem>>, %arg6: memref<1x32x96xbf16, #tpu.memory_space<vmem>>, %arg7: memref<1x32x32xbf16, #tpu.memory_space<vmem>>, %arg8: memref<1x1x32xf32, #tpu.memory_space<vmem>>, %arg9: memref<1x32x64xbf16, #tpu.memory_space<vmem>>, %arg10: memref<1x64x32xbf16, #tpu.memory_space<vmem>>, %arg11: memref<1x32xf32, #tpu.memory_space<vmem>>, %arg12: memref<24x32xbf16, #tpu.memory_space<vmem>>, %arg13: memref<24x32xf32, #tpu.memory_space<vmem>>) attributes {dimension_semantics = [#tpu.dimension_semantics<parallel>, #tpu.dimension_semantics<arbitrary>], iteration_bounds = array<i64: 2, 2>, scalar_prefetch = 0 : i64, scratch_operands = 1 : i64, tpu.core_type = #tpu.core_type<tc>, window_params = [{transform_indices = @transform_0, window_bounds = array<i64: 24, 32>}, {pipeline_mode = #tpu.pipeline_mode<synchronous>, transform_indices = @transform_1, window_bounds = array<i64: 4, 8, 8>}, {transform_indices = @transform_2, window_bounds = array<i64: 1, 3, 1, 8>}, {transform_indices = @transform_3, window_bounds = array<i64: 1, 1, 32>}, {transform_indices = @transform_4, window_bounds = array<i64: 1, 32, 96>}, {transform_indices = @transform_5, window_bounds = array<i64: 1, 32, 32>}, {transform_indices = @transform_6, window_bounds = array<i64: 1, 1, 32>}, {transform_indices = @transform_7, window_bounds = array<i64: 1, 32, 64>}, {transform_indices = @transform_8, window_bounds = array<i64: 1, 64, 32>}, {pipeline_mode = #tpu.pipeline_mode<synchronous>, transform_indices = @transform_9, window_bounds = array<i64: 1, 32>}, {transform_indices = @transform_10, window_bounds = array<i64: 24, 32>}]} {
    %c0_i32 = arith.constant 0 : i32
    %0 = arith.cmpi eq, %arg1, %c0_i32 : i32
    %1 = arith.extui %0 : i1 to i32
    %c0_i32_0 = arith.constant 0 : i32
    %2 = arith.cmpi ne, %1, %c0_i32_0 : i32
    scf.if %2 {
      %c0_62 = arith.constant 0 : index
      %c0_63 = arith.constant 0 : index
      %154 = vector.load %arg2[%c0_62, %c0_63] : memref<24x32xbf16, #tpu.memory_space<vmem>>, vector<24x32xbf16>
      %155 = arith.extf %154 : vector<24x32xbf16> to vector<24x32xf32>
      %c0_64 = arith.constant 0 : index
      %c0_65 = arith.constant 0 : index
      %156 = vector.load %arg13[%c0_64, %c0_65] : memref<24x32xf32, #tpu.memory_space<vmem>>, vector<24x32xf32>
      tpu.vector_store %arg13[%c0_64, %c0_65], %155 {strides = array<i32>} : memref<24x32xf32, #tpu.memory_space<vmem>>, vector<24x32xf32>,
    } else {
    }
    %c0 = arith.constant 0 : index
    %c0_1 = arith.constant 0 : index
    %3 = vector.load %arg13[%c0, %c0_1] : memref<24x32xf32, #tpu.memory_space<vmem>>, vector<24x32xf32>
    %c0_2 = arith.constant 0 : index
    %c0_3 = arith.constant 0 : index
    %c0_4 = arith.constant 0 : index
    %4 = vector.load %arg5[%c0_2, %c0_3, %c0_4] : memref<1x1x32xf32, #tpu.memory_space<vmem>>, vector<1x1x32xf32>
    %5 = vector.shape_cast %4 : vector<1x1x32xf32> to vector<1x32xf32>
    %6 = arith.mulf %3, %3 : vector<24x32xf32>
    %cst = arith.constant dense<0.000000e+00> : vector<24xf32>
    %7 = vector.multi_reduction <add>, %6, %cst [1] : vector<24x32xf32> to vector<24xf32>
    %8 = vector.shape_cast %7 : vector<24xf32> to vector<24x1xf32>
    %cst_5 = arith.constant 3.200000e+01 : f32
    %9 = vector.broadcast %cst_5 : f32 to vector<24x1xf32>
    %10 = arith.divf %8, %9 : vector<24x1xf32>
    %cst_6 = arith.constant 9.99999997E-7 : f32
    %11 = vector.broadcast %cst_6 : f32 to vector<24x1xf32>
    %12 = arith.addf %10, %11 : vector<24x1xf32>
    %13 = math.rsqrt %12 : vector<24x1xf32>
    %14 = vector.broadcast %13 : vector<24x1xf32> to vector<24x32xf32>
    %15 = arith.mulf %3, %14 : vector<24x32xf32>
    %16 = vector.broadcast %5 : vector<1x32xf32> to vector<24x32xf32>
    %17 = arith.mulf %15, %16 : vector<24x32xf32>
    %18 = arith.truncf %17 : vector<24x32xf32> to vector<24x32xbf16>
    %c0_7 = arith.constant 0 : index
    %c0_8 = arith.constant 0 : index
    %c0_9 = arith.constant 0 : index
    %19 = vector.load %arg6[%c0_7, %c0_8, %c0_9] : memref<1x32x96xbf16, #tpu.memory_space<vmem>>, vector<1x32x96xbf16>
    %20 = vector.shape_cast %19 : vector<1x32x96xbf16> to vector<32x96xbf16>
    %cst_10 = arith.constant dense<0.000000e+00> : vector<24x96xf32>
    %21 = tpu.matmul %18, %20, %cst_10 {dimension_numbers = #tpu.dot_dimension_numbers<[1], [0], [0], [1], [0, 0, 1, 1], [], []>} : vector<24x32xbf16>, vector<32x96xbf16>, vector<24x96xf32> -> vector<24x96xf32>
    %22 = vector.shape_cast %21 : vector<24x96xf32> to vector<3x8x96xf32>
    %23 = arith.truncf %22 : vector<3x8x96xf32> to vector<3x8x96xbf16>
    %c0_11 = arith.constant 0 : index
    %c0_12 = arith.constant 0 : index
    %c0_13 = arith.constant 0 : index
    %c0_14 = arith.constant 0 : index
    %24 = vector.load %arg4[%c0_11, %c0_12, %c0_13, %c0_14] : memref<1x3x1x8xf32, #tpu.memory_space<vmem>>, vector<1x3x1x8xf32>
    %25 = vector.shape_cast %24 : vector<1x3x1x8xf32> to vector<3x1x8xf32>
    %26 = vector.extract_strided_slice %23 {offsets = [0, 0, 0], sizes = [3, 8, 8], strides = [1, 1, 1]} : vector<3x8x96xbf16> to vector<3x8x8xbf16>
    %27 = vector.extract_strided_slice %23 {offsets = [0, 0, 32], sizes = [3, 8, 8], strides = [1, 1, 1]} : vector<3x8x96xbf16> to vector<3x8x8xbf16>
    %28 = vector.extract_strided_slice %23 {offsets = [0, 0, 64], sizes = [3, 8, 8], strides = [1, 1, 1]} : vector<3x8x96xbf16> to vector<3x8x8xbf16>
    "tpu.trace_start"() <{level = 10 : i32, message = "pqd,pkd->pqk"}> : () -> ()
    %cst_15 = arith.constant dense<0.000000e+00> : vector<3x8x8xf32>
    %29 = tpu.matmul %26, %27, %cst_15 {dimension_numbers = #tpu.dot_dimension_numbers<[2], [2], [1], [1], [0, 0, 0, 1, 1, 1], [0], [0]>} : vector<3x8x8xbf16>, vector<3x8x8xbf16>, vector<3x8x8xf32> -> vector<3x8x8xf32>
    "tpu.trace_stop"() : () -> ()
    %c0_16 = arith.constant 0 : index
    %c0_17 = arith.constant 0 : index
    %c0_18 = arith.constant 0 : index
    %30 = vector.load %arg3[%c0_16, %c0_17, %c0_18] : memref<4x8x8xf32, #tpu.memory_space<vmem>>, vector<1x8x8xf32>
    %31 = vector.shape_cast %30 : vector<1x8x8xf32> to vector<8x8xf32>
    %32 = vector.shape_cast %31 : vector<8x8xf32> to vector<1x8x8xf32>
    %33 = vector.broadcast %32 : vector<1x8x8xf32> to vector<3x8x8xf32>
    %34 = arith.addf %29, %33 : vector<3x8x8xf32>
    %35 = vector.broadcast %25 : vector<3x1x8xf32> to vector<3x8x8xf32>
    %36 = arith.addf %34, %35 : vector<3x8x8xf32>
    %cst_19 = arith.constant dense<0xFF800000> : vector<3x8xf32>
    %37 = vector.multi_reduction <maximumf>, %36, %cst_19 [2] : vector<3x8x8xf32> to vector<3x8xf32>
    %38 = vector.shape_cast %37 : vector<3x8xf32> to vector<3x8x1xf32>
    %39 = vector.broadcast %38 : vector<3x8x1xf32> to vector<3x8x8xf32>
    %40 = arith.subf %36, %39 : vector<3x8x8xf32>
    %41 = math.exp %40 : vector<3x8x8xf32>
    %cst_20 = arith.constant dense<0.000000e+00> : vector<3x8xf32>
    %42 = vector.multi_reduction <add>, %41, %cst_20 [2] : vector<3x8x8xf32> to vector<3x8xf32>
    %43 = vector.shape_cast %42 : vector<3x8xf32> to vector<3x8x1xf32>
    %44 = tpu.reciprocal %43 {approx = true} : vector<3x8x1xf32> -> vector<3x8x1xf32>
    %45 = vector.broadcast %44 : vector<3x8x1xf32> to vector<3x8x8xf32>
    %46 = arith.mulf %41, %45 : vector<3x8x8xf32>
    %47 = arith.truncf %46 : vector<3x8x8xf32> to vector<3x8x8xbf16>
    "tpu.trace_start"() <{level = 10 : i32, message = "pqk,pkd->pqd"}> : () -> ()
    %cst_21 = arith.constant dense<0.000000e+00> : vector<3x8x8xf32>
    %48 = tpu.matmul %47, %28, %cst_21 {dimension_numbers = #tpu.dot_dimension_numbers<[2], [1], [1], [2], [0, 0, 0, 1, 1, 2], [0], [0]>} : vector<3x8x8xbf16>, vector<3x8x8xbf16>, vector<3x8x8xf32> -> vector<3x8x8xf32>
    "tpu.trace_stop"() : () -> ()
    %49 = vector.extract_strided_slice %23 {offsets = [0, 0, 8], sizes = [3, 8, 8], strides = [1, 1, 1]} : vector<3x8x96xbf16> to vector<3x8x8xbf16>
    %50 = vector.extract_strided_slice %23 {offsets = [0, 0, 40], sizes = [3, 8, 8], strides = [1, 1, 1]} : vector<3x8x96xbf16> to vector<3x8x8xbf16>
    %51 = vector.extract_strided_slice %23 {offsets = [0, 0, 72], sizes = [3, 8, 8], strides = [1, 1, 1]} : vector<3x8x96xbf16> to vector<3x8x8xbf16>
    "tpu.trace_start"() <{level = 10 : i32, message = "pqd,pkd->pqk"}> : () -> ()
    %cst_22 = arith.constant dense<0.000000e+00> : vector<3x8x8xf32>
    %52 = tpu.matmul %49, %50, %cst_22 {dimension_numbers = #tpu.dot_dimension_numbers<[2], [2], [1], [1], [0, 0, 0, 1, 1, 1], [0], [0]>} : vector<3x8x8xbf16>, vector<3x8x8xbf16>, vector<3x8x8xf32> -> vector<3x8x8xf32>
    "tpu.trace_stop"() : () -> ()
    %c1 = arith.constant 1 : index
    %c0_23 = arith.constant 0 : index
    %c0_24 = arith.constant 0 : index
    %53 = vector.load %arg3[%c1, %c0_23, %c0_24] : memref<4x8x8xf32, #tpu.memory_space<vmem>>, vector<1x8x8xf32>
    %54 = vector.shape_cast %53 : vector<1x8x8xf32> to vector<8x8xf32>
    %55 = vector.shape_cast %54 : vector<8x8xf32> to vector<1x8x8xf32>
    %56 = vector.broadcast %55 : vector<1x8x8xf32> to vector<3x8x8xf32>
    %57 = arith.addf %52, %56 : vector<3x8x8xf32>
    %58 = vector.broadcast %25 : vector<3x1x8xf32> to vector<3x8x8xf32>
    %59 = arith.addf %57, %58 : vector<3x8x8xf32>
    %cst_25 = arith.constant dense<0xFF800000> : vector<3x8xf32>
    %60 = vector.multi_reduction <maximumf>, %59, %cst_25 [2] : vector<3x8x8xf32> to vector<3x8xf32>
    %61 = vector.shape_cast %60 : vector<3x8xf32> to vector<3x8x1xf32>
    %62 = vector.broadcast %61 : vector<3x8x1xf32> to vector<3x8x8xf32>
    %63 = arith.subf %59, %62 : vector<3x8x8xf32>
    %64 = math.exp %63 : vector<3x8x8xf32>
    %cst_26 = arith.constant dense<0.000000e+00> : vector<3x8xf32>
    %65 = vector.multi_reduction <add>, %64, %cst_26 [2] : vector<3x8x8xf32> to vector<3x8xf32>
    %66 = vector.shape_cast %65 : vector<3x8xf32> to vector<3x8x1xf32>
    %67 = tpu.reciprocal %66 {approx = true} : vector<3x8x1xf32> -> vector<3x8x1xf32>
    %68 = vector.broadcast %67 : vector<3x8x1xf32> to vector<3x8x8xf32>
    %69 = arith.mulf %64, %68 : vector<3x8x8xf32>
    %70 = arith.truncf %69 : vector<3x8x8xf32> to vector<3x8x8xbf16>
    "tpu.trace_start"() <{level = 10 : i32, message = "pqk,pkd->pqd"}> : () -> ()
    %cst_27 = arith.constant dense<0.000000e+00> : vector<3x8x8xf32>
    %71 = tpu.matmul %70, %51, %cst_27 {dimension_numbers = #tpu.dot_dimension_numbers<[2], [1], [1], [2], [0, 0, 0, 1, 1, 2], [0], [0]>} : vector<3x8x8xbf16>, vector<3x8x8xbf16>, vector<3x8x8xf32> -> vector<3x8x8xf32>
    "tpu.trace_stop"() : () -> ()
    %72 = vector.extract_strided_slice %23 {offsets = [0, 0, 16], sizes = [3, 8, 8], strides = [1, 1, 1]} : vector<3x8x96xbf16> to vector<3x8x8xbf16>
    %73 = vector.extract_strided_slice %23 {offsets = [0, 0, 48], sizes = [3, 8, 8], strides = [1, 1, 1]} : vector<3x8x96xbf16> to vector<3x8x8xbf16>
    %74 = vector.extract_strided_slice %23 {offsets = [0, 0, 80], sizes = [3, 8, 8], strides = [1, 1, 1]} : vector<3x8x96xbf16> to vector<3x8x8xbf16>
    "tpu.trace_start"() <{level = 10 : i32, message = "pqd,pkd->pqk"}> : () -> ()
    %cst_28 = arith.constant dense<0.000000e+00> : vector<3x8x8xf32>
    %75 = tpu.matmul %72, %73, %cst_28 {dimension_numbers = #tpu.dot_dimension_numbers<[2], [2], [1], [1], [0, 0, 0, 1, 1, 1], [0], [0]>} : vector<3x8x8xbf16>, vector<3x8x8xbf16>, vector<3x8x8xf32> -> vector<3x8x8xf32>
    "tpu.trace_stop"() : () -> ()
    %c2 = arith.constant 2 : index
    %c0_29 = arith.constant 0 : index
    %c0_30 = arith.constant 0 : index
    %76 = vector.load %arg3[%c2, %c0_29, %c0_30] : memref<4x8x8xf32, #tpu.memory_space<vmem>>, vector<1x8x8xf32>
    %77 = vector.shape_cast %76 : vector<1x8x8xf32> to vector<8x8xf32>
    %78 = vector.shape_cast %77 : vector<8x8xf32> to vector<1x8x8xf32>
    %79 = vector.broadcast %78 : vector<1x8x8xf32> to vector<3x8x8xf32>
    %80 = arith.addf %75, %79 : vector<3x8x8xf32>
    %81 = vector.broadcast %25 : vector<3x1x8xf32> to vector<3x8x8xf32>
    %82 = arith.addf %80, %81 : vector<3x8x8xf32>
    %cst_31 = arith.constant dense<0xFF800000> : vector<3x8xf32>
    %83 = vector.multi_reduction <maximumf>, %82, %cst_31 [2] : vector<3x8x8xf32> to vector<3x8xf32>
    %84 = vector.shape_cast %83 : vector<3x8xf32> to vector<3x8x1xf32>
    %85 = vector.broadcast %84 : vector<3x8x1xf32> to vector<3x8x8xf32>
    %86 = arith.subf %82, %85 : vector<3x8x8xf32>
    %87 = math.exp %86 : vector<3x8x8xf32>
    %cst_32 = arith.constant dense<0.000000e+00> : vector<3x8xf32>
    %88 = vector.multi_reduction <add>, %87, %cst_32 [2] : vector<3x8x8xf32> to vector<3x8xf32>
    %89 = vector.shape_cast %88 : vector<3x8xf32> to vector<3x8x1xf32>
    %90 = tpu.reciprocal %89 {approx = true} : vector<3x8x1xf32> -> vector<3x8x1xf32>
    %91 = vector.broadcast %90 : vector<3x8x1xf32> to vector<3x8x8xf32>
    %92 = arith.mulf %87, %91 : vector<3x8x8xf32>
    %93 = arith.truncf %92 : vector<3x8x8xf32> to vector<3x8x8xbf16>
    "tpu.trace_start"() <{level = 10 : i32, message = "pqk,pkd->pqd"}> : () -> ()
    %cst_33 = arith.constant dense<0.000000e+00> : vector<3x8x8xf32>
    %94 = tpu.matmul %93, %74, %cst_33 {dimension_numbers = #tpu.dot_dimension_numbers<[2], [1], [1], [2], [0, 0, 0, 1, 1, 2], [0], [0]>} : vector<3x8x8xbf16>, vector<3x8x8xbf16>, vector<3x8x8xf32> -> vector<3x8x8xf32>
    "tpu.trace_stop"() : () -> ()
    %95 = vector.extract_strided_slice %23 {offsets = [0, 0, 24], sizes = [3, 8, 8], strides = [1, 1, 1]} : vector<3x8x96xbf16> to vector<3x8x8xbf16>
    %96 = vector.extract_strided_slice %23 {offsets = [0, 0, 56], sizes = [3, 8, 8], strides = [1, 1, 1]} : vector<3x8x96xbf16> to vector<3x8x8xbf16>
    %97 = vector.extract_strided_slice %23 {offsets = [0, 0, 88], sizes = [3, 8, 8], strides = [1, 1, 1]} : vector<3x8x96xbf16> to vector<3x8x8xbf16>
    "tpu.trace_start"() <{level = 10 : i32, message = "pqd,pkd->pqk"}> : () -> ()
    %cst_34 = arith.constant dense<0.000000e+00> : vector<3x8x8xf32>
    %98 = tpu.matmul %95, %96, %cst_34 {dimension_numbers = #tpu.dot_dimension_numbers<[2], [2], [1], [1], [0, 0, 0, 1, 1, 1], [0], [0]>} : vector<3x8x8xbf16>, vector<3x8x8xbf16>, vector<3x8x8xf32> -> vector<3x8x8xf32>
    "tpu.trace_stop"() : () -> ()
    %c3 = arith.constant 3 : index
    %c0_35 = arith.constant 0 : index
    %c0_36 = arith.constant 0 : index
    %99 = vector.load %arg3[%c3, %c0_35, %c0_36] : memref<4x8x8xf32, #tpu.memory_space<vmem>>, vector<1x8x8xf32>
    %100 = vector.shape_cast %99 : vector<1x8x8xf32> to vector<8x8xf32>
    %101 = vector.shape_cast %100 : vector<8x8xf32> to vector<1x8x8xf32>
    %102 = vector.broadcast %101 : vector<1x8x8xf32> to vector<3x8x8xf32>
    %103 = arith.addf %98, %102 : vector<3x8x8xf32>
    %104 = vector.broadcast %25 : vector<3x1x8xf32> to vector<3x8x8xf32>
    %105 = arith.addf %103, %104 : vector<3x8x8xf32>
    %cst_37 = arith.constant dense<0xFF800000> : vector<3x8xf32>
    %106 = vector.multi_reduction <maximumf>, %105, %cst_37 [2] : vector<3x8x8xf32> to vector<3x8xf32>
    %107 = vector.shape_cast %106 : vector<3x8xf32> to vector<3x8x1xf32>
    %108 = vector.broadcast %107 : vector<3x8x1xf32> to vector<3x8x8xf32>
    %109 = arith.subf %105, %108 : vector<3x8x8xf32>
    %110 = math.exp %109 : vector<3x8x8xf32>
    %cst_38 = arith.constant dense<0.000000e+00> : vector<3x8xf32>
    %111 = vector.multi_reduction <add>, %110, %cst_38 [2] : vector<3x8x8xf32> to vector<3x8xf32>
    %112 = vector.shape_cast %111 : vector<3x8xf32> to vector<3x8x1xf32>
    %113 = tpu.reciprocal %112 {approx = true} : vector<3x8x1xf32> -> vector<3x8x1xf32>
    %114 = vector.broadcast %113 : vector<3x8x1xf32> to vector<3x8x8xf32>
    %115 = arith.mulf %110, %114 : vector<3x8x8xf32>
    %116 = arith.truncf %115 : vector<3x8x8xf32> to vector<3x8x8xbf16>
    "tpu.trace_start"() <{level = 10 : i32, message = "pqk,pkd->pqd"}> : () -> ()
    %cst_39 = arith.constant dense<0.000000e+00> : vector<3x8x8xf32>
    %117 = tpu.matmul %116, %97, %cst_39 {dimension_numbers = #tpu.dot_dimension_numbers<[2], [1], [1], [2], [0, 0, 0, 1, 1, 2], [0], [0]>} : vector<3x8x8xbf16>, vector<3x8x8xbf16>, vector<3x8x8xf32> -> vector<3x8x8xf32>
    "tpu.trace_stop"() : () -> ()
    %118 = tpu.concatenate %48, %71, %94, %117 in 2 : vector<3x8x8xf32>, vector<3x8x8xf32>, vector<3x8x8xf32>, vector<3x8x8xf32> -> vector<3x8x32xf32>
    %119 = vector.shape_cast %118 : vector<3x8x32xf32> to vector<24x32xf32>
    %120 = arith.truncf %119 : vector<24x32xf32> to vector<24x32xbf16>
    %c0_40 = arith.constant 0 : index
    %c0_41 = arith.constant 0 : index
    %c0_42 = arith.constant 0 : index
    %121 = vector.load %arg7[%c0_40, %c0_41, %c0_42] : memref<1x32x32xbf16, #tpu.memory_space<vmem>>, vector<1x32x32xbf16>
    %122 = vector.shape_cast %121 : vector<1x32x32xbf16> to vector<32x32xbf16>
    %cst_43 = arith.constant dense<0.000000e+00> : vector<24x32xf32>
    %123 = tpu.matmul %120, %122, %cst_43 {dimension_numbers = #tpu.dot_dimension_numbers<[1], [0], [0], [1], [0, 0, 1, 1], [], []>} : vector<24x32xbf16>, vector<32x32xbf16>, vector<24x32xf32> -> vector<24x32xf32>
    %124 = arith.addf %3, %123 : vector<24x32xf32>
    %c0_44 = arith.constant 0 : index
    %c0_45 = arith.constant 0 : index
    %c0_46 = arith.constant 0 : index
    %125 = vector.load %arg8[%c0_44, %c0_45, %c0_46] : memref<1x1x32xf32, #tpu.memory_space<vmem>>, vector<1x1x32xf32>
    %126 = vector.shape_cast %125 : vector<1x1x32xf32> to vector<1x32xf32>
    %127 = arith.mulf %124, %124 : vector<24x32xf32>
    %cst_47 = arith.constant dense<0.000000e+00> : vector<24xf32>
    %128 = vector.multi_reduction <add>, %127, %cst_47 [1] : vector<24x32xf32> to vector<24xf32>
    %129 = vector.shape_cast %128 : vector<24xf32> to vector<24x1xf32>
    %cst_48 = arith.constant 3.200000e+01 : f32
    %130 = vector.broadcast %cst_48 : f32 to vector<24x1xf32>
    %131 = arith.divf %129, %130 : vector<24x1xf32>
    %cst_49 = arith.constant 9.99999997E-7 : f32
    %132 = vector.broadcast %cst_49 : f32 to vector<24x1xf32>
    %133 = arith.addf %131, %132 : vector<24x1xf32>
    %134 = math.rsqrt %133 : vector<24x1xf32>
    %135 = vector.broadcast %134 : vector<24x1xf32> to vector<24x32xf32>
    %136 = arith.mulf %124, %135 : vector<24x32xf32>
    %137 = vector.broadcast %126 : vector<1x32xf32> to vector<24x32xf32>
    %138 = arith.mulf %136, %137 : vector<24x32xf32>
    %139 = arith.truncf %138 : vector<24x32xf32> to vector<24x32xbf16>
    %c0_50 = arith.constant 0 : index
    %c0_51 = arith.constant 0 : index
    %c0_52 = arith.constant 0 : index
    %140 = vector.load %arg9[%c0_50, %c0_51, %c0_52] : memref<1x32x64xbf16, #tpu.memory_space<vmem>>, vector<1x32x64xbf16>
    %141 = vector.shape_cast %140 : vector<1x32x64xbf16> to vector<32x64xbf16>
    %cst_53 = arith.constant dense<0.000000e+00> : vector<24x64xf32>
    %142 = tpu.matmul %139, %141, %cst_53 {dimension_numbers = #tpu.dot_dimension_numbers<[1], [0], [0], [1], [0, 0, 1, 1], [], []>} : vector<24x32xbf16>, vector<32x64xbf16>, vector<24x64xf32> -> vector<24x64xf32>
    %cst_54 = arith.constant 0.000000e+00 : f32
    %143 = vector.broadcast %cst_54 : f32 to vector<24x64xf32>
    %144 = arith.maximumf %142, %143 : vector<24x64xf32>
    %145 = arith.truncf %144 : vector<24x64xf32> to vector<24x64xbf16>
    %c0_55 = arith.constant 0 : index
    %c0_56 = arith.constant 0 : index
    %c0_57 = arith.constant 0 : index
    %146 = vector.load %arg10[%c0_55, %c0_56, %c0_57] : memref<1x64x32xbf16, #tpu.memory_space<vmem>>, vector<1x64x32xbf16>
    %147 = vector.shape_cast %146 : vector<1x64x32xbf16> to vector<64x32xbf16>
    %cst_58 = arith.constant dense<0.000000e+00> : vector<24x32xf32>
    %148 = tpu.matmul %145, %147, %cst_58 {dimension_numbers = #tpu.dot_dimension_numbers<[1], [0], [0], [1], [0, 0, 1, 1], [], []>} : vector<24x64xbf16>, vector<64x32xbf16>, vector<24x32xf32> -> vector<24x32xf32>
    %149 = arith.addf %124, %148 : vector<24x32xf32>
    %c0_59 = arith.constant 0 : index
    %c0_60 = arith.constant 0 : index
    %150 = vector.load %arg13[%c0_59, %c0_60] : memref<24x32xf32, #tpu.memory_space<vmem>>, vector<24x32xf32>
    tpu.vector_store %arg13[%c0_59, %c0_60], %149 {strides = array<i32>} : memref<24x32xf32, #tpu.memory_space<vmem>>, vector<24x32xf32>,
    %c1_i32 = arith.constant 1 : i32
    %151 = arith.cmpi eq, %arg1, %c1_i32 : i32
    %152 = arith.extui %151 : i1 to i32
    %c0_i32_61 = arith.constant 0 : i32
    %153 = arith.cmpi ne, %152, %c0_i32_61 : i32
    scf.if %153 {
      %c0_62 = arith.constant 0 : index
      %c0_63 = arith.constant 0 : index
      %154 = vector.load %arg11[%c0_62, %c0_63] : memref<1x32xf32, #tpu.memory_space<vmem>>, vector<1x32xf32>
      %155 = arith.mulf %149, %149 : vector<24x32xf32>
      %cst_64 = arith.constant dense<0.000000e+00> : vector<24xf32>
      %156 = vector.multi_reduction <add>, %155, %cst_64 [1] : vector<24x32xf32> to vector<24xf32>
      %157 = vector.shape_cast %156 : vector<24xf32> to vector<24x1xf32>
      %cst_65 = arith.constant 3.200000e+01 : f32
      %158 = vector.broadcast %cst_65 : f32 to vector<24x1xf32>
      %159 = arith.divf %157, %158 : vector<24x1xf32>
      %cst_66 = arith.constant 9.99999997E-7 : f32
      %160 = vector.broadcast %cst_66 : f32 to vector<24x1xf32>
      %161 = arith.addf %159, %160 : vector<24x1xf32>
      %162 = math.rsqrt %161 : vector<24x1xf32>
      %163 = vector.broadcast %162 : vector<24x1xf32> to vector<24x32xf32>
      %164 = arith.mulf %149, %163 : vector<24x32xf32>
      %165 = vector.broadcast %154 : vector<1x32xf32> to vector<24x32xf32>
      %166 = arith.mulf %164, %165 : vector<24x32xf32>
      %167 = arith.truncf %166 : vector<24x32xf32> to vector<24x32xbf16>
      %c0_67 = arith.constant 0 : index
      %c0_68 = arith.constant 0 : index
      %168 = vector.load %arg12[%c0_67, %c0_68] : memref<24x32xbf16, #tpu.memory_space<vmem>>, vector<24x32xbf16>
      tpu.vector_store %arg12[%c0_67, %c0_68], %167 {strides = array<i32>} : memref<24x32xbf16, #tpu.memory_space<vmem>>, vector<24x32xbf16>,
    } else {
    }
    return
  }
  func.func @transform_0(%arg0: i32, %arg1: i32) -> (i32, i32) {
    %c0_i32 = arith.constant 0 : i32
    %c0_i32_0 = arith.constant 0 : i32
    return %arg0, %c0_i32 : i32, i32
  }
  func.func @transform_1(%arg0: i32, %arg1: i32) -> (i32, i32, i32) {
    %c0_i32 = arith.constant 0 : i32
    %c0_i32_0 = arith.constant 0 : i32
    %c0_i32_1 = arith.constant 0 : i32
    %c0_i32_2 = arith.constant 0 : i32
    return %c0_i32, %c0_i32_0, %c0_i32_1 : i32, i32, i32
  }
  func.func @transform_2(%arg0: i32, %arg1: i32) -> (i32, i32, i32, i32) {
    %c0_i32 = arith.constant 0 : i32
    %c0_i32_0 = arith.constant 0 : i32
    %c0_i32_1 = arith.constant 0 : i32
    %c0_i32_2 = arith.constant 0 : i32
    return %arg0, %c0_i32, %c0_i32_0, %c0_i32_1 : i32, i32, i32, i32
  }
  func.func @transform_3(%arg0: i32, %arg1: i32) -> (i32, i32, i32) {
    %c0_i32 = arith.constant 0 : i32
    %c0_i32_0 = arith.constant 0 : i32
    %c0_i32_1 = arith.constant 0 : i32
    return %arg1, %c0_i32, %c0_i32_0 : i32, i32, i32
  }
  func.func @transform_4(%arg0: i32, %arg1: i32) -> (i32, i32, i32) {
    %c0_i32 = arith.constant 0 : i32
    %c0_i32_0 = arith.constant 0 : i32
    %c0_i32_1 = arith.constant 0 : i32
    return %arg1, %c0_i32, %c0_i32_0 : i32, i32, i32
  }
  func.func @transform_5(%arg0: i32, %arg1: i32) -> (i32, i32, i32) {
    %c0_i32 = arith.constant 0 : i32
    %c0_i32_0 = arith.constant 0 : i32
    %c0_i32_1 = arith.constant 0 : i32
    return %arg1, %c0_i32, %c0_i32_0 : i32, i32, i32
  }
  func.func @transform_6(%arg0: i32, %arg1: i32) -> (i32, i32, i32) {
    %c0_i32 = arith.constant 0 : i32
    %c0_i32_0 = arith.constant 0 : i32
    %c0_i32_1 = arith.constant 0 : i32
    return %arg1, %c0_i32, %c0_i32_0 : i32, i32, i32
  }
  func.func @transform_7(%arg0: i32, %arg1: i32) -> (i32, i32, i32) {
    %c0_i32 = arith.constant 0 : i32
    %c0_i32_0 = arith.constant 0 : i32
    %c0_i32_1 = arith.constant 0 : i32
    return %arg1, %c0_i32, %c0_i32_0 : i32, i32, i32
  }
  func.func @transform_8(%arg0: i32, %arg1: i32) -> (i32, i32, i32) {
    %c0_i32 = arith.constant 0 : i32
    %c0_i32_0 = arith.constant 0 : i32
    %c0_i32_1 = arith.constant 0 : i32
    return %arg1, %c0_i32, %c0_i32_0 : i32, i32, i32
  }
  func.func @transform_9(%arg0: i32, %arg1: i32) -> (i32, i32) {
    %c0_i32 = arith.constant 0 : i32
    %c0_i32_0 = arith.constant 0 : i32
    %c0_i32_1 = arith.constant 0 : i32
    return %c0_i32, %c0_i32_0 : i32, i32
  }
  func.func @transform_10(%arg0: i32, %arg1: i32) -> (i32, i32) {
    %c0_i32 = arith.constant 0 : i32
    %c0_i32_0 = arith.constant 0 : i32
    return %arg0, %c0_i32 : i32, i32
  }
}

</mosaic_0001>

<bundles_post_ra>
// kernel: _lambda_.1
= control target key start
LH: loop header
LB: loop body
LE: loop exit
PB: predicated region body
PF: predicated region fallthrough
CT: control target
= control target key end

     0   :  { %s3731_s0 = inlined_call_operand.vmem [shape: bf16[48,32], index: 0, kind: input, shape index: {}]   ;;  %s3732_s1 = inlined_call_operand.vmem [shape: f32[4,8,8], index: 1, kind: input, shape index: {}]   ;;  %s3733_s2 = inlined_call_operand.vmem [shape: f32[2,3,1,8], index: 2, kind: input, shape index: {}]   ;;  %s3734_s3 = inlined_call_operand.vmem [shape: f32[2,1,32], index: 3, kind: input, shape index: {}, may-alias: {3,6}]   ;;  %s3735_s4 = inlined_call_operand.vmem [shape: bf16[2,32,96], index: 4, kind: input, shape index: {}]   ;;  %s3736_s5 = inlined_call_operand.vmem [shape: bf16[2,32,32], index: 5, kind: input, shape index: {}]   ;;  %s3737_s6 = inlined_call_operand.vmem [shape: f32[2,1,32], index: 6, kind: input, shape index: {}, may-alias: {3,6}]   ;;  %s3738_s7 = inlined_call_operand.vmem [shape: bf16[2,32,64], index: 7, kind: input, shape index: {}]   ;;  %s3739_s8 = inlined_call_operand.vmem [shape: bf16[2,64,32], index: 8, kind: input, shape index: {}]   ;;  %s3740_s9 = inlined_call_operand.vmem [shape: f32[1,32], index: 9, kind: input, shape index: {}]   ;;  %s3741_s10 = inlined_call_operand.hbm [shape: bf16[48,32], index: 10, kind: output, shape index: {}]  }
   0x1   :  { %3754 = sst [smem:[#allocation16_spill]] %s3731_s0 }
   0x2   :  { %3755 = sst [smem:[#allocation17_spill]] %s3733_s2 }
   0x3   :  { %3756 = sst [smem:[#allocation18_spill]] %s3741_s10 }
   0x4   :  { %15 = vsyncpa [#allocation4], 0 }
   0x5   :  { %17 = vsyncpa [#allocation4 + $0x1], 0  ;;  %s3216_s13 = smov 0   ;;  %s3218_s14 = smov 0  }
   0x6   :  { %s3220_s15 = smov 0   ;;  %s3222_s16 = smov 0  }
   0x7   :  { %s3224_s17 = smov 0   ;;  %s3226_s18 = smov 0  }
   0x8   :  { %s3228_s19 = smov 0   ;;  %s3230_s20 = smov 0  }
   0x9 LB: > { %3757 = sst [smem:[#allocation6_spill]] %s3113_s13  ;;  %s2532_s21 = sadd.s32 4294967295, %s3141_s20   ;;  %s3141_s20 = sphi %s3230_s20, %s23_s20   ;;  %s3137_s19 = sphi %s3228_s19, %s3783_s19   ;;  %s3133_s18 = sphi %s3226_s18, %s3782_s18   ;;  %s3129_s17 = sphi %s3224_s17, %s3781_s17   ;;  %s3125_s16 = sphi %s3222_s16, %s3780_s16   ;;  %s3121_s15 = sphi %s3220_s15, %s3779_s15   ;;  %s3117_s14 = sphi %s3218_s14, %s3785_s14   ;;  %s3113_s13 = sphi %s3216_s13, %s3784_s13  }
   0xa   : > { %3758 = sst [smem:[#allocation7_spill]] %s3121_s15  ;;  %s2533_s22 = sadd.s32 4294967294, %s3141_s20  }
   0xb   : > { %3759 = sst [smem:[#allocation8_spill]] %s3133_s18  ;;  %s32_s23 = sadd.s32 1, %s3133_s18 }
   0xc   : > { %3760 = sst [smem:[#allocation9_spill]] %s3137_s19  ;;  %p33_p0 = scmp.ge.s32.totalorder %s32_s23, 2 }
   0xd   : > { %3761 = sst [smem:[#allocation10_spill]] %s3141_s20  ;;  %s35_s24 = sadd.s32 1, %s3137_s19 }
   0xe   : > { %p302_p1 = scmp.ne.s32.totalorder %s3121_s15, %s3117_s14  ;;  %p303_p2 = scmp.eq.s32.totalorder %s2532_s21, 3 }
   0xf   : > { %s3787_s23 = smov (%p33_p0, %s32_s23), 0  ;;  %s3789_s24 = smov (!%p33_p0, %s35_s24), %s3137_s19 }
  0x10   : > { %3762 = sst [smem:[#allocation11_spill]] %s3787_s23  ;;  %p3265_p3 = por %p303_p2, %p302_p1 }
  0x11   : > { %p308_p4 = scmp.ne.s32.totalorder %s3117_s14, %s3113_s13  ;;  %p37_p5 = scmp.ge.s32.totalorder %s3789_s24, 2 }
  0x12   : > { %s3763_s25 = scalar_select %p3265_p3, 1, 0 }
  0x13   : > { %p309_p6 = scmp.eq.s32.totalorder %s2533_s22, 3  ;;  %p2536_p7 = scmp.ge.s32.totalorder %s3141_s20, 1 }
  0x14   : > { %3764 = sst [smem:[#allocation12_spill]] %s3763_s25  ;;  %p393_p8 = scmp.lt.s32.totalorder %s3141_s20, 5 }
  0x15   : > { %s3791_s24 = smov (%p37_p5, %s3789_s24), 0  ;;  %p3275_p9 = por %p309_p6, %p308_p4 }
  0x16   : > { %3765 = sst [smem:[#allocation13_spill]] %s3791_s24  ;;  %p394_p10 = pnand %p2536_p7, %p393_p8 }
  0x17   : > { %s3766_s26 = scalar_select %p3275_p9, 1, 0 }
  0x18   : > { %s289_s27 = ssub.s32 %s3137_s19, %s3791_s24  ;;  %s292_s28 = sadd.s32 1, %s3121_s15 }
  0x19   : > { %3767 = sst [smem:[#allocation14_spill]] %s3766_s26  ;;  %p290_p11 = scmp.eq.s32.totalorder %s289_s27, 0 }
  0x1a   : > { %397 = sbr.rel (%p394_p10) target bundleno = 4135 (0x1027), region = 60  ;;  %s3745_s30 = sand.u32 (!%p394_p10), 1, %s3117_s14  }
  0x1b   : > { %s3283_s29 = scalar_select %p290_p11, %s3121_s15, %s292_s28  }
  0x1c   : > { %s461_s11 = smul.u32 (!%p394_p10), 3, %s3129_s17  ;;  %p467_p12 = scmp.lt.s32.totalorder (!%p394_p10), %s3129_s17, 1 }
  0x1d   : > { %3768 = sst [smem:[#allocation15_spill]] %s3283_s29  ;;  %s2863_s12 = smul.u32 (!%p394_p10), 12, %s3745_s30 }
  0x1e   : > { %p462_p13 = scmp.lt.s32.totalorder (!%p394_p10), %s461_s11, 5  ;;  %p471_p0 = scmp.lt.s32.totalorder (!%p394_p10), %s3125_s16, 1 }
  0x1f   : > { %s3769_s0 = sld [smem:[#allocation16_spill]] (!%p394_p10)  ;;  %s3770_s2 = sld [smem:[#allocation17_spill]] (!%p394_p10) }
  0x20   : > { %s3333_s27 = scalar_lea.vmem (!%p394_p10), [#allocation3], %s2863_s12  ;;  %p2546_p1 = scmp.ne.s32.totalorder (!%p394_p10), %s3125_s16, 0 }
  0x21   : > { %s3793_s11 = smov (!%p462_p13, %s461_s11), 5  ;;  %vm509_vm0 = vcmask (!%p2546_p1), 261120  }
  0x22   : > { %s468_s21 = scalar_select %p467_p12, %s3129_s17, 1 }
  0x23   : > { %s2537_s22 = sshll.u32 %s3793_s11, 2 }
  0x24   : > { %s2864_s23 = smul.u32 3, %s468_s21 }
  0x25   : > { %s465_s24 = scalar_lea.vmem %s3769_s0, %s2537_s22  ;;  %502 = sbr.rel (%p2546_p1) target bundleno = 44 (0x2c), region = 64 }
  0x26   : > { %s3296_s19 = scalar_select %p471_p0, %s3125_s16, 1 }
  0x27   : > { %s3301_s30 = scalar_lea.vmem %s3770_s2, %s2864_s23  ;;  %v2614_v0 = vld [vmem:[%s465_s24] sm:$0xff] (!%p2546_p1)   ;;  %v505_v1 = vld [vmem:[%s465_s24 + $0x8] sm:$0xf] (!%p2546_p1) }
  0x28   : > { %s2605_s13 = sshll.u32 %s3296_s19, 4  ;;  %s486_s23 = scalar_lea.vmem %s3737_s6, %s3296_s19  ;;  %v2615_v2 = vunpack.c.l.bf16 (!%p2546_p1), %v2614_v0  ;;  %v2616_v3 = vunpack.c.h.bf16 (!%p2546_p1), %v2614_v0  ;;  %v508_v4 = vunpack.c.l.bf16 (!%p2546_p1), %v505_v1 }
  0x29   : > { %s3311_s21 = scalar_lea.vmem %s3735_s4, %s2605_s13  ;;  %s3316_s18 = scalar_lea.vmem %s3736_s5, %s2605_s13 }
  0x2a   : > { %s3325_s15 = scalar_lea.vmem %s3738_s7, %s2605_s13  ;;  %s2608_s26 = sshll.u32 %s3296_s19, 5  ;;  %510 = vst.msk [vmem:[#allocation2] sm:$0xff] (!%p2546_p1), %vm509_vm0, %v2615_v2  ;;  %511 = vst.msk [vmem:[#allocation2 + $0x8] sm:$0xff] (!%p2546_p1), %vm509_vm0, %v2616_v3 }
  0x2b   : > { %s3331_s20 = scalar_lea.vmem %s3739_s8, %s2608_s26  ;;  %512 = vst.msk [vmem:[#allocation2 + $0x10] sm:$0xff] (!%p2546_p1), %vm509_vm0, %v508_v4 }
  0x2c PF: > { %vm520_vm1 = vcmask 261120   ;;  %v2968_v14 = vld [vmem:[%s3311_s21] sm:$0xff]   ;;  %v2969_v15 = vld [vmem:[%s3311_s21 + $0x8] sm:$0xff]   ;;  %s3771_s10 = scalar_lea.vmem %s3734_s3, %s3296_s19  ;;  %v3143_v37 = vmov 0.0   ;;  %vm3144_vm2 = vmmov 0   ;;  %s3145_s13 = smov 96  }
  0x2d   : > { %2683 = vmatprep.subr.bf16.mxu0 %v2968_v14  ;;  %v2547_v28 = vld [vmem:[%s3771_s10] ss:$0 sm:$0xff]  ;;  %2691 = vmatprep.subr.bf16.mxu1 %v3143_v37  ;;  %vm634_vm3 = vcmask 64512   ;;  %v3388_v58 = vld [vmem:[%s3301_s30 + $0x1] ss:$0 sm:$0xff]  ;;  %s3147_s12 = smov 88  }
  0x2e   : > { %2684 = vmatpush3.bf16.msra.mxu0 %v2968_v14  ;;  %2693 = vmatprep.mubr.msk.bf16.mxu1 %vm3144_vm2, %v3143_v37  ;;  %v630_v51 = vld [vmem:[%s3732_s1] sm:$0xff]  ;;  %s3148_s11 = smov 120   ;;  %vm841_vm4 = vcmask 1043456   ;;  %s3149_s28 = smov 56   ;;  %vm2025_vm5 = vcmask 130048   ;;  %vm2029_vm6 = vcmask 195584  }
  0x2f   : > { %2685 = vmatprep.subr.bf16.mxu0 %v2969_v15  ;;  %v3385_v53 = vld [vmem:[%s3301_s30] ss:$0 sm:$0xff]  ;;  %s3150_s29 = smov 80   ;;  %s3151_s26 = smov 112   ;;  %vm2251_vm7 = vcmask 523264  }
  0x30   : > { %s3152_s10 = smov 48   ;;  %s3154_s24 = smov 104  }
  0x31   : > { %v513_v5 = vld [vmem:[#allocation2] sm:$0xff]  ;;  %v514_v6 = vld [vmem:[#allocation2 + $0x8] sm:$0xff]  ;;  %s3156_s21 = smov 8   ;;  %s3157_s22 = smov 16  }
  0x32   : > { %v515_v7 = vld [vmem:[#allocation2 + $0x10] sm:$0xff]  ;;  %v517_v8 = vmul.f32 %v513_v5, %v513_v5  ;;  %v518_v9 = vmul.f32 %v514_v6, %v514_v6  ;;  %2686 = vmatpush3.bf16.msra.mxu0 %v2969_v15  ;;  %p2597_p2 = scmp.ne.s32.totalorder %s3125_s16, 1 }
  0x33   : > { %v519_v10 = vmul.f32 %v515_v7, %v515_v7  ;;  %2697 = vmatprep.subr.bf16.mxu0 %v3143_v37  ;;  %vm2363_vm8 = vcmask (!%p2597_p2), 257024  }
  0x34   : > { %v521_v11 = vsel %vm520_vm1, %v517_v8, 0.0  ;;  %v524_v12 = vsel %vm520_vm1, %v518_v9, 0.0 }
  0x35   : > { %v527_v13 = vsel %vm520_vm1, %v519_v10, 0.0  ;;  %522 = vadd.xlane.f32.xlu0 %v521_v11 }
  0x36   : > { %528 = vadd.xlane.f32.xlu1 %v527_v13 }
  0x39   : > { %525 = vadd.xlane.f32.xlu0 %v524_v12 }
  0xc2   : > { %v523_v16 = vpop.xlane.xlu0 %522 }
  0xc3   : > { %v529_v17 = vpop.xlane.xlu1 %528  ;;  %v531_v18 = vmul.f32 0.03125, %v523_v16 }
  0xc4   : > { %v533_v19 = vmul.f32 0.03125, %v529_v17 }
  0xc5   : > { %v534_v20 = vadd.f32 1e-06, %v531_v18 }
  0xc6   : > { %v536_v21 = vadd.f32 1e-06, %v533_v19  ;;  %v526_v22 = vpop.xlane.xlu0 %525 }
  0xc7   : > { %2978 = vrsqrt.f32 %v534_v20  ;;  %v532_v23 = vmul.f32 0.03125, %v526_v22 }
  0xc8   : > { %2980 = vrsqrt.f32 %v536_v21 }
  0xc9   : > { %v535_v24 = vadd.f32 1e-06, %v532_v23 }
  0xcb   : > { %2982 = vrsqrt.f32 %v535_v24 }
  0xd1   : > { %v2979_v25 = vpop.eup %2978 }
  0xd2   : > { %v2981_v26 = vpop.eup %2980  ;;  %v540_v29 = vmul.f32 %v2979_v25, %v513_v5  ;;  %v3395_v5 = vld [vmem:[%s3301_s30 + $0x2] ss:$0 sm:$0xff]  ;;  %s3146_s30 = smov 64  }
  0xd3   : > { %v542_v27 = vmul.f32 %v2981_v26, %v515_v7 }
  0xd4   : > { %v549_v33 = vmul.f32 %v2547_v28, %v540_v29 }
  0xd5   : > { %v2983_v30 = vpop.eup %2982  ;;  %v551_v31 = vmul.f32 %v2547_v28, %v542_v27 }
  0xd6   : > { %v541_v32 = vmul.f32 %v2983_v30, %v514_v6 }
  0xd7   : > { %v553_v35 = vpack.c.bf16 %v551_v31, %v551_v31 }
  0xd8   : > { %v550_v34 = vmul.f32 %v2547_v28, %v541_v32 }
  0xda   : > { %v552_v36 = vpack.c.bf16 %v550_v34, %v549_v33 }
  0xdc   : > { %2687 = vmatprep.mubr.msk.bf16.mxu0 %vm520_vm1, %v552_v36 }
  0xdd   : > { %2688 = vmatmul.mubr.msk.bf16.vlgmr.msra.gmra.mrb[0].mxu0 %vm520_vm1, %v553_v35 }
  0xde   : > { %2699 = vmatprep.mubr.msk.bf16.mxu0 %vm3144_vm2, %v3143_v37 }
 0x1b0   : > { %v2689_v38 = vpop.f32.mrb[0].mxu0 }
 0x1b1   : > { %v610_v39 = vpop.f32.mrb[1].mxu0  ;;  %v3359_v44 = vpack.c.bf16 %v2689_v38, %v2689_v38 }
 0x1b2   : > { %v3354_v40 = vpack.c.bf16 %v610_v39, %v610_v39  ;;  %v2690_v41 = vpop.f32.mrb[2].mxu0 }
 0x1b3   : > { %v613_v42 = vpop.f32.mrb[3].mxu0 }
 0x1b4   : > { %v3356_v43 = vpack.c.bf16 %v613_v42, %v613_v42  ;;  %632 = vrot.lane.b32.xlu1 %v3354_v40, %s3145_s13 }
 0x1b6   : > { %682 = vrot.lane.b32.xlu0 %v3356_v43, %s3145_s13 }
 0x1b8   : > { %731 = vrot.lane.b32.xlu1 %v3359_v44, %s3145_s13  ;;  %s3153_s13 = smov 72  }
 0x226   : > { %v633_v45 = vpop.permute.xlu1 %632 }
 0x227   : > { %v639_v46 = vsel %vm634_vm3, %v633_v45, 0 }
 0x228   : > { %2692 = vmatpush3.bf16.xpose.msra.mxu1 %v639_v46  ;;  %v683_v47 = vpop.permute.xlu0 %682 }
 0x229   : > { %v688_v48 = vsel %vm634_vm3, %v683_v47, 0  ;;  %2703 = vmatprep.subr.bf16.mxu1 %v3143_v37 }
 0x22a   : > { %2698 = vmatpush3.bf16.xpose.msra.mxu0 %v688_v48  ;;  %v732_v49 = vpop.permute.xlu1 %731 }
 0x22b   : > { %2709 = vmatprep.subr.bf16.mxu0 %v3143_v37  ;;  %v737_v50 = vsel %vm634_vm3, %v732_v49, 0 }
 0x22f   : > { %2694 = vmatmul.mubr.msk.bf16.vlgmr.msra.gmra.mrb[0].mxu1 %vm634_vm3, %v3354_v40 }
 0x230   : > { %2704 = vmatpush3.bf16.xpose.msra.mxu1 %v737_v50  ;;  %2705 = vmatprep.mubr.msk.bf16.mxu1 %vm3144_vm2, %v3143_v37 }
 0x231   : > { %2700 = vmatmul.mubr.msk.bf16.vlgmr.msra.gmra.mrb[4].mxu0 %vm634_vm3, %v3356_v43  ;;  %2715 = vmatprep.subr.bf16.mxu1 %v3143_v37 }
 0x232   : > { %2711 = vmatprep.mubr.msk.bf16.mxu0 %vm3144_vm2, %v3143_v37 }
 0x237   : > { %2706 = vmatmul.mubr.msk.bf16.vlgmr.msra.gmra.mrb[4].mxu1 %vm634_vm3, %v3359_v44 }
 0x238   : > { %2717 = vmatprep.mubr.msk.bf16.mxu1 %vm3144_vm2, %v3143_v37 }
 0x302   : > { %v675_v52 = vpop.f32.mrb[0].mxu1 }
 0x303   : > { %v676_v54 = vadd.f32 %v675_v52, %v630_v51  ;;  %v2695_v55 = vpop.f32.mrb[1].mxu1 }
 0x304   : > { %v678_v56 = vpop.f32.mrb[2].mxu1  ;;  %v724_v57 = vpop.f32.mrb[4].mxu0 }
 0x305   : > { %v725_v59 = vadd.f32 %v724_v57, %v630_v51  ;;  %v2696_v60 = vpop.f32.mrb[3].mxu1  ;;  %v2701_v61 = vpop.f32.mrb[5].mxu0  ;;  %v797_v62 = vadd.f32 %v3385_v53, %v676_v54 }
 0x306   : > { %v727_v63 = vpop.f32.mrb[6].mxu0 }
 0x307   : > { %v2702_v0 = vpop.f32.mrb[7].mxu0  ;;  %v800_v1 = vsel %vm634_vm3, %v797_v62, -inf  ;;  %v798_v2 = vadd.f32 %v3388_v58, %v725_v59 }
 0x308   : > { %801 = vmax.xlane.f32.xlu1 %v800_v1 }
 0x309   : > { %v803_v3 = vsel %vm634_vm3, %v798_v2, -inf }
 0x30a   : > { %v773_v4 = vpop.f32.mrb[4].mxu1  ;;  %804 = vmax.xlane.f32.xlu0 %v803_v3 }
 0x30b   : > { %v774_v6 = vadd.f32 %v773_v4, %v630_v51  ;;  %v2707_v7 = vpop.f32.mrb[5].mxu1  ;;  %v2561_v4 = vld [vmem:[%s3732_s1 + $0x8] sm:$0xff] }
 0x30c   : > { %v776_v8 = vpop.f32.mrb[6].mxu1 }
 0x30d   : > { %v2708_v9 = vpop.f32.mrb[7].mxu1  ;;  %v799_v10 = vadd.f32 %v3395_v5, %v774_v6 }
 0x30f   : > { %v806_v11 = vsel %vm634_vm3, %v799_v10, -inf }
 0x310   : > { %807 = vmax.xlane.f32.xlu0 %v806_v11 }
 0x395   : > { %v802_v12 = vpop.xlane.xlu1 %801 }
 0x396   : > { %v809_v13 = vsub.f32 %v797_v62, %v802_v12 }
 0x397   : > { %v805_v14 = vpop.xlane.xlu0 %804 }
 0x398   : > { %v812_v15 = vmul.f32 1.442695, %v809_v13  ;;  %v810_v16 = vsub.f32 %v798_v2, %v805_v14 }
 0x39a   : > { %2984 = vpow2.f32 %v812_v15  ;;  %v814_v17 = vmul.f32 1.442695, %v810_v16 }
 0x39c   : > { %2986 = vpow2.f32 %v814_v17 }
 0x39d   : > { %v808_v22 = vpop.xlane.xlu0 %807 }
 0x39e   : > { %v811_v23 = vsub.f32 %v799_v10, %v808_v22 }
 0x3a0   : > { %v816_v24 = vmul.f32 1.442695, %v811_v23 }
 0x3a2   : > { %2988 = vpow2.f32 %v816_v24 }
 0x3a4   : > { %v2985_v18 = vpop.eup %2984 }
 0x3a5   : > { %v818_v19 = vsel %vm634_vm3, %v2985_v18, 0.0 }
 0x3a6   : > { %v2987_v20 = vpop.eup %2986  ;;  %819 = vadd.xlane.f32.xlu1 %v818_v19 }
 0x3a7   : > { %v821_v21 = vsel %vm634_vm3, %v2987_v20, 0.0 }
 0x3a8   : > { %822 = vadd.xlane.f32.xlu0 %v821_v21 }
 0x3ac   : > { %v2989_v25 = vpop.eup %2988 }
 0x3ad   : > { %v824_v26 = vsel %vm634_vm3, %v2989_v25, 0.0 }
 0x3b7   : > { %836 = vrot.lane.b32.xlu1 %v3354_v40, %s3146_s30 }
 0x3bb   : > { %933 = vrot.lane.b32.xlu1 %v3359_v44, %s3146_s30 }
 0x3be   : > { %885 = vrot.lane.b32.xlu0 %v3356_v43, %s3146_s30 }
 0x3bf   : > { %985 = vrot.lane.b32.xlu1 %v3354_v40, %s3147_s12 }
 0x3c2   : > { %1035 = vrot.lane.b32.xlu0 %v3356_v43, %s3147_s12 }
 0x3c6   : > { %1085 = vrot.lane.b32.xlu0 %v3359_v44, %s3147_s12 }
 0x3ca   : > { %1083 = vrot.lane.b32.xlu0 %v3359_v44, %s3148_s11 }
 0x3e3   : > { %825 = vadd.xlane.f32.xlu1 %v824_v26 }
 0x3f4   : > { %983 = vrot.lane.b32.xlu1 %v3354_v40, %s3148_s11 }
 0x3f8   : > { %1033 = vrot.lane.b32.xlu1 %v3356_v43, %s3148_s11  ;;  %s3155_s11 = smov 40  }
 0x433   : > { %v820_v27 = vpop.xlane.xlu1 %819 }
 0x434   : > { %2990 = vrcp.f32 %v820_v27 }
 0x435   : > { %v823_v28 = vpop.xlane.xlu0 %822 }
 0x436   : > { %2992 = vrcp.f32 %v823_v28 }
 0x437   : > { %v837_v29 = vpop.permute.xlu1 %836 }
 0x438   : > { %v843_v30 = vsel %vm841_vm4, %v837_v29, 0 }
 0x439   : > { %2710 = vmatpush3.bf16.msra.mxu0 %v843_v30  ;;  %v886_v31 = vpop.permute.xlu0 %885 }
 0x43a   : > { %v891_v32 = vsel %vm841_vm4, %v886_v31, 0  ;;  %2721 = vmatprep.subr.bf16.mxu0 %v3143_v37 }
 0x43b   : > { %2716 = vmatpush3.bf16.msra.mxu1 %v891_v32  ;;  %v934_v33 = vpop.permute.xlu1 %933 }
 0x43c   : > { %2727 = vmatprep.subr.bf16.mxu1 %v3143_v37  ;;  %v939_v42 = vsel %vm841_vm4, %v934_v33, 0 }
 0x43d   : > { %v1036_v47 = vpop.permute.xlu0 %1035 }
 0x43e   : > { %v2991_v34 = vpop.eup %2990  ;;  %v1041_v57 = vsel %vm634_vm3, %v1036_v47, 0 }
 0x43f   : > { %v830_v35 = vmul.f32 %v2991_v34, %v2985_v18  ;;  %v986_v41 = vpop.permute.xlu1 %985 }
 0x440   : > { %v2993_v36 = vpop.eup %2992  ;;  %v991_v46 = vsel %vm634_vm3, %v986_v41, 0 }
 0x441   : > { %v831_v38 = vmul.f32 %v2993_v36, %v2987_v20  ;;  %v833_v39 = vpack.c.bf16 %v830_v35, %v830_v35  ;;  %v1086_v49 = vpop.permute.xlu0 %1085 }
 0x442   : > { %v1091_v51 = vsel %vm634_vm3, %v1086_v49, 0 }
 0x443   : > { %2712 = vmatmul.mubr.msk.bf16.vlgmr.msra.gmra.mrb[8].mxu0 %vm634_vm3, %v833_v39  ;;  %v834_v45 = vpack.c.bf16 %v831_v38, %v831_v38 }
 0x444   : > { %2722 = vmatpush3.bf16.msra.mxu0 %v939_v42  ;;  %2723 = vmatprep.mubr.msk.bf16.mxu0 %vm3144_vm2, %v3143_v37 }
 0x445   : > { %2718 = vmatmul.mubr.msk.bf16.vlgmr.msra.gmra.mrb[8].mxu1 %vm634_vm3, %v834_v45  ;;  %2733 = vmatprep.subr.bf16.mxu0 %v3143_v37  ;;  %v1084_v54 = vpop.permute.xlu0 %1083 }
 0x446   : > { %2728 = vmatpush3.bf16.xpose.msra.mxu1 %v991_v46  ;;  %2729 = vmatprep.mubr.msk.bf16.mxu1 %vm3144_vm2, %v3143_v37 }
 0x447   : > { %2739 = vmatprep.subr.bf16.mxu1 %v3143_v37 }
 0x470   : > { %v826_v48 = vpop.xlane.xlu1 %825 }
 0x471   : > { %2994 = vrcp.f32 %v826_v48 }
 0x474   : > { %v984_v50 = vpop.permute.xlu1 %983 }
 0x475   : > { %2730 = vmatmul.mubr.msk.bf16.vlgmr.msra.gmra.mrb[12].mxu1 %vm634_vm3, %v984_v50 }
 0x476   : > { %2740 = vmatpush3.bf16.xpose.msra.mxu1 %v1091_v51  ;;  %2741 = vmatprep.mubr.msk.bf16.mxu1 %vm3144_vm2, %v3143_v37 }
 0x477   : > { %2751 = vmatprep.subr.bf16.mxu1 %v3143_v37 }
 0x478   : > { %v1034_v59 = vpop.permute.xlu1 %1033 }
 0x47b   : > { %v2995_v52 = vpop.eup %2994 }
 0x47c   : > { %v832_v55 = vmul.f32 %v2995_v52, %v2989_v25 }
 0x47d   : > { %2742 = vmatmul.mubr.msk.bf16.vlgmr.msra.gmra.mrb[16].mxu1 %vm634_vm3, %v1084_v54 }
 0x47e   : > { %v835_v56 = vpack.c.bf16 %v832_v55, %v832_v55  ;;  %2753 = vmatprep.mubr.msk.bf16.mxu1 %vm3144_vm2, %v3143_v37 }
 0x480   : > { %2724 = vmatmul.mubr.msk.bf16.vlgmr.msra.gmra.mrb[12].mxu0 %vm634_vm3, %v835_v56 }
 0x481   : > { %2734 = vmatpush3.bf16.xpose.msra.mxu0 %v1041_v57  ;;  %2735 = vmatprep.mubr.msk.bf16.mxu0 %vm3144_vm2, %v3143_v37 }
 0x482   : > { %2745 = vmatprep.subr.bf16.mxu0 %v3143_v37 }
 0x488   : > { %2736 = vmatmul.mubr.msk.bf16.vlgmr.msra.gmra.mrb[16].mxu0 %vm634_vm3, %v1034_v59 }
 0x489   : > { %2747 = vmatprep.mubr.msk.bf16.mxu0 %vm3144_vm2, %v3143_v37 }
 0x516   : > { %v3444_v60 = vpop.f32.mrb[8].mxu0 }
 0x517   : > { %v2713_v61 = vpop.f32.mrb[9].mxu0 }
 0x518   : > { %v882_v62 = vpop.f32.mrb[10].mxu0  ;;  %v3446_v63 = vpop.f32.mrb[8].mxu1 }
 0x519   : > { %v2714_v0 = vpop.f32.mrb[11].mxu0  ;;  %v2719_v1 = vpop.f32.mrb[9].mxu1 }
 0x51a   : > { %v930_v2 = vpop.f32.mrb[10].mxu1 }
 0x51b   : > { %v2720_v3 = vpop.f32.mrb[11].mxu1 }
 0x548   : > { %v1027_v6 = vpop.f32.mrb[12].mxu1 }
 0x549   : > { %v1028_v7 = vadd.f32 %v2561_v4, %v1027_v6  ;;  %v2731_v8 = vpop.f32.mrb[13].mxu1 }
 0x54a   : > { %v1030_v9 = vpop.f32.mrb[14].mxu1 }
 0x54b   : > { %v2732_v10 = vpop.f32.mrb[15].mxu1  ;;  %v1133_v11 = vadd.f32 %v3385_v53, %v1028_v7 }
 0x54d   : > { %v1136_v12 = vsel %vm634_vm3, %v1133_v11, -inf }
 0x54e   : > { %1137 = vmax.xlane.f32.xlu1 %v1136_v12 }
 0x550   : > { %v1127_v13 = vpop.f32.mrb[16].mxu1 }
 0x551   : > { %v2743_v14 = vpop.f32.mrb[17].mxu1  ;;  %v1128_v22 = vadd.f32 %v2561_v4, %v1127_v13 }
 0x552   : > { %v1130_v15 = vpop.f32.mrb[18].mxu1 }
 0x553   : > { %v3453_v16 = vpop.f32.mrb[12].mxu0  ;;  %v2744_v17 = vpop.f32.mrb[19].mxu1  ;;  %v1135_v29 = vadd.f32 %v3395_v5, %v1128_v22 }
 0x554   : > { %v2725_v18 = vpop.f32.mrb[13].mxu0 }
 0x555   : > { %v978_v19 = vpop.f32.mrb[14].mxu0  ;;  %v1142_v30 = vsel %vm634_vm3, %v1135_v29, -inf }
 0x556   : > { %v2726_v20 = vpop.f32.mrb[15].mxu0 }
 0x55b   : > { %v1077_v21 = vpop.f32.mrb[16].mxu0 }
 0x55c   : > { %v1078_v23 = vadd.f32 %v2561_v4, %v1077_v21  ;;  %v2737_v24 = vpop.f32.mrb[17].mxu0 }
 0x55d   : > { %v1080_v25 = vpop.f32.mrb[18].mxu0 }
 0x55e   : > { %v2738_v26 = vpop.f32.mrb[19].mxu0  ;;  %v1134_v27 = vadd.f32 %v3388_v58, %v1078_v23 }
 0x55f   : > { %1172 = vrot.lane.b32.xlu1 %v3354_v40, %s3149_s28 }
 0x560   : > { %v1139_v28 = vsel %vm634_vm3, %v1134_v27, -inf }
 0x561   : > { %1140 = vmax.xlane.f32.xlu0 %v1139_v28 }
 0x565   : > { %1143 = vmax.xlane.f32.xlu0 %v1142_v30 }
 0x5db   : > { %v1138_v31 = vpop.xlane.xlu1 %1137 }
 0x5dc   : > { %v1145_v32 = vsub.f32 %v1133_v11, %v1138_v31 }
 0x5de   : > { %v1148_v33 = vmul.f32 1.442695, %v1145_v32  ;;  %v2568_v32 = vld [vmem:[%s3732_s1 + $0x10] sm:$0xff] }
 0x5df   : > { %v1173_v34 = vpop.permute.xlu1 %1172 }
 0x5e0   : > { %2996 = vpow2.f32 %v1148_v33  ;;  %v1178_v35 = vsel %vm841_vm4, %v1173_v34, 0 }
 0x5e1   : > { %2746 = vmatpush3.bf16.msra.mxu0 %v1178_v35 }
 0x5e2   : > { %2757 = vmatprep.subr.bf16.mxu0 %v3143_v37 }
 0x5ea   : > { %v2997_v36 = vpop.eup %2996 }
 0x5eb   : > { %v1154_v38 = vsel %vm634_vm3, %v2997_v36, 0.0 }
 0x5ec   : > { %1155 = vadd.xlane.f32.xlu0 %v1154_v38 }
 0x5ee   : > { %v1141_v39 = vpop.xlane.xlu0 %1140 }
 0x5ef   : > { %v1146_v41 = vsub.f32 %v1134_v27, %v1141_v39 }
 0x5f1   : > { %v1150_v42 = vmul.f32 1.442695, %v1146_v41 }
 0x5f2   : > { %v1144_v45 = vpop.xlane.xlu0 %1143 }
 0x5f3   : > { %2998 = vpow2.f32 %v1150_v42  ;;  %v1147_v46 = vsub.f32 %v1135_v29, %v1144_v45 }
 0x5f5   : > { %v1152_v47 = vmul.f32 1.442695, %v1147_v46 }
 0x5f7   : > { %3000 = vpow2.f32 %v1152_v47 }
 0x5fd   : > { %v2999_v48 = vpop.eup %2998 }
 0x5fe   : > { %v1157_v49 = vsel %vm634_vm3, %v2999_v48, 0.0 }
 0x5ff   : > { %1158 = vadd.xlane.f32.xlu1 %v1157_v49 }
 0x601   : > { %v3001_v50 = vpop.eup %3000 }
 0x602   : > { %v1160_v51 = vsel %vm634_vm3, %v3001_v50, 0.0 }
 0x603   : > { %1161 = vadd.xlane.f32.xlu0 %v1160_v51 }
 0x610   : > { %1268 = vrot.lane.b32.xlu1 %v3359_v44, %s3149_s28 }
 0x614   : > { %1320 = vrot.lane.b32.xlu1 %v3354_v40, %s3150_s29 }
 0x618   : > { %1370 = vrot.lane.b32.xlu1 %v3356_v43, %s3150_s29 }
 0x619   : > { %1220 = vrot.lane.b32.xlu0 %v3356_v43, %s3149_s28  ;;  %s3158_s28 = smov 24  }
 0x61c   : > { %1420 = vrot.lane.b32.xlu1 %v3359_v44, %s3150_s29 }
 0x61d   : > { %1318 = vrot.lane.b32.xlu0 %v3354_v40, %s3151_s26 }
 0x620   : > { %1418 = vrot.lane.b32.xlu1 %v3359_v44, %s3151_s26 }
 0x621   : > { %1368 = vrot.lane.b32.xlu0 %v3356_v43, %s3151_s26 }
 0x679   : > { %v1156_v52 = vpop.xlane.xlu0 %1155 }
 0x67a   : > { %3002 = vrcp.f32 %v1156_v52 }
 0x684   : > { %v3003_v54 = vpop.eup %3002 }
 0x685   : > { %v1166_v55 = vmul.f32 %v3003_v54, %v2997_v36 }
 0x687   : > { %v1169_v56 = vpack.c.bf16 %v1166_v55, %v1166_v55 }
 0x689   : > { %2748 = vmatmul.mubr.msk.bf16.vlgmr.msra.gmra.mrb[20].mxu0 %vm634_vm3, %v1169_v56 }
 0x68a   : > { %2759 = vmatprep.mubr.msk.bf16.mxu0 %vm3144_vm2, %v3143_v37 }
 0x68c   : > { %v1159_v57 = vpop.xlane.xlu1 %1158 }
 0x68d   : > { %3004 = vrcp.f32 %v1159_v57 }
 0x690   : > { %v1269_v59 = vpop.permute.xlu1 %1268  ;;  %v1162_v61 = vpop.xlane.xlu0 %1161 }
 0x691   : > { %v1274_v62 = vsel %vm841_vm4, %v1269_v59, 0  ;;  %3006 = vrcp.f32 %v1162_v61 }
 0x692   : > { %2758 = vmatpush3.bf16.msra.mxu0 %v1274_v62 }
 0x693   : > { %2769 = vmatprep.subr.bf16.mxu0 %v3143_v37 }
 0x694   : > { %v1221_v0 = vpop.permute.xlu0 %1220  ;;  %v1321_v3 = vpop.permute.xlu1 %1320 }
 0x695   : > { %v1226_v1 = vsel %vm841_vm4, %v1221_v0, 0  ;;  %v1326_v10 = vsel %vm634_vm3, %v1321_v3, 0 }
 0x696   : > { %2752 = vmatpush3.bf16.msra.mxu1 %v1226_v1 }
 0x697   : > { %v3005_v2 = vpop.eup %3004  ;;  %2763 = vmatprep.subr.bf16.mxu1 %v3143_v37 }
 0x698   : > { %v1167_v4 = vmul.f32 %v3005_v2, %v2999_v48  ;;  %v1371_v9 = vpop.permute.xlu1 %1370  ;;  %v1319_v13 = vpop.permute.xlu0 %1318 }
 0x699   : > { %v1376_v12 = vsel %vm634_vm3, %v1371_v9, 0 }
 0x69a   : > { %v1170_v6 = vpack.c.bf16 %v1167_v4, %v1167_v4 }
 0x69b   : > { %v3007_v7 = vpop.eup %3006 }
 0x69c   : > { %v1168_v8 = vmul.f32 %v3007_v7, %v3001_v50  ;;  %2754 = vmatmul.mubr.msk.bf16.vlgmr.msra.gmra.mrb[20].mxu1 %vm634_vm3, %v1170_v6  ;;  %v1421_v14 = vpop.permute.xlu1 %1420  ;;  %v1369_v17 = vpop.permute.xlu0 %1368 }
 0x69d   : > { %2765 = vmatprep.mubr.msk.bf16.mxu1 %vm3144_vm2, %v3143_v37  ;;  %v1426_v15 = vsel %vm634_vm3, %v1421_v14, 0 }
 0x69e   : > { %v1171_v11 = vpack.c.bf16 %v1168_v8, %v1168_v8 }
 0x69f   : > { %2764 = vmatpush3.bf16.xpose.msra.mxu1 %v1326_v10 }
 0x6a0   : > { %2760 = vmatmul.mubr.msk.bf16.vlgmr.msra.gmra.mrb[24].mxu0 %vm634_vm3, %v1171_v11  ;;  %2775 = vmatprep.subr.bf16.mxu1 %v3143_v37  ;;  %v1419_v18 = vpop.permute.xlu1 %1418 }
 0x6a1   : > { %2770 = vmatpush3.bf16.xpose.msra.mxu0 %v1376_v12  ;;  %2771 = vmatprep.mubr.msk.bf16.mxu0 %vm3144_vm2, %v3143_v37 }
 0x6a2   : > { %2781 = vmatprep.subr.bf16.mxu0 %v3143_v37 }
 0x6a6   : > { %2766 = vmatmul.mubr.msk.bf16.vlgmr.msra.gmra.mrb[24].mxu1 %vm634_vm3, %v1319_v13 }
 0x6a7   : > { %2776 = vmatpush3.bf16.xpose.msra.mxu1 %v1426_v15  ;;  %2777 = vmatprep.mubr.msk.bf16.mxu1 %vm3144_vm2, %v3143_v37 }
 0x6a8   : > { %2772 = vmatmul.mubr.msk.bf16.vlgmr.msra.gmra.mrb[28].mxu0 %vm634_vm3, %v1369_v17  ;;  %2787 = vmatprep.subr.bf16.mxu1 %v3143_v37 }
 0x6a9   : > { %2783 = vmatprep.mubr.msk.bf16.mxu0 %vm3144_vm2, %v3143_v37 }
 0x6ae   : > { %2778 = vmatmul.mubr.msk.bf16.vlgmr.msra.gmra.mrb[28].mxu1 %vm634_vm3, %v1419_v18 }
 0x6af   : > { %2789 = vmatprep.mubr.msk.bf16.mxu1 %vm3144_vm2, %v3143_v37 }
 0x75c   : > { %v3504_v19 = vpop.f32.mrb[20].mxu0 }
 0x75d   : > { %v2749_v20 = vpop.f32.mrb[21].mxu0 }
 0x75e   : > { %v1217_v21 = vpop.f32.mrb[22].mxu0 }
 0x75f   : > { %v2750_v22 = vpop.f32.mrb[23].mxu0 }
 0x76f   : > { %v3506_v23 = vpop.f32.mrb[20].mxu1 }
 0x770   : > { %v2953_v24 = vpack.i.bf16 %v3506_v23, %v3504_v19  ;;  %v2755_v25 = vpop.f32.mrb[21].mxu1 }
 0x771   : > { %v1265_v26 = vpop.f32.mrb[22].mxu1 }
 0x772   : > { %v2756_v27 = vpop.f32.mrb[23].mxu1 }
 0x773   : > { %v3510_v28 = vpop.f32.mrb[24].mxu0 }
 0x774   : > { %v2761_v29 = vpop.f32.mrb[25].mxu0 }
 0x775   : > { %v1313_v30 = vpop.f32.mrb[26].mxu0 }
 0x776   : > { %v2762_v31 = vpop.f32.mrb[27].mxu0 }
 0x779   : > { %v1362_v33 = vpop.f32.mrb[24].mxu1 }
 0x77a   : > { %v1363_v34 = vadd.f32 %v2568_v32, %v1362_v33  ;;  %v2767_v35 = vpop.f32.mrb[25].mxu1 }
 0x77b   : > { %v1365_v36 = vpop.f32.mrb[26].mxu1  ;;  %v1412_v38 = vpop.f32.mrb[28].mxu0 }
 0x77c   : > { %v1413_v39 = vadd.f32 %v2568_v32, %v1412_v38  ;;  %v2768_v41 = vpop.f32.mrb[27].mxu1  ;;  %v2773_v42 = vpop.f32.mrb[29].mxu0  ;;  %v1468_v45 = vadd.f32 %v3385_v53, %v1363_v34 }
 0x77d   : > { %v1415_v46 = vpop.f32.mrb[30].mxu0 }
 0x77e   : > { %v2774_v47 = vpop.f32.mrb[31].mxu0  ;;  %v1471_v48 = vsel %vm634_vm3, %v1468_v45, -inf  ;;  %v1469_v49 = vadd.f32 %v3388_v58, %v1413_v39 }
 0x77f   : > { %1472 = vmax.xlane.f32.xlu0 %v1471_v48 }
 0x780   : > { %v1474_v50 = vsel %vm634_vm3, %v1469_v49, -inf }
 0x781   : > { %v1462_v51 = vpop.f32.mrb[28].mxu1  ;;  %1475 = vmax.xlane.f32.xlu1 %v1474_v50 }
 0x782   : > { %v1463_v52 = vadd.f32 %v2568_v32, %v1462_v51  ;;  %v2779_v54 = vpop.f32.mrb[29].mxu1 }
 0x783   : > { %v1465_v55 = vpop.f32.mrb[30].mxu1 }
 0x784   : > { %v2780_v56 = vpop.f32.mrb[31].mxu1  ;;  %v1470_v57 = vadd.f32 %v3395_v5, %v1463_v52 }
 0x786   : > { %v1477_v59 = vsel %vm634_vm3, %v1470_v57, -inf }
 0x787   : > { %1478 = vmax.xlane.f32.xlu0 %v1477_v59 }
 0x792   : > { %1507 = vrot.lane.b32.xlu1 %v3354_v40, %s3152_s10 }
 0x796   : > { %1603 = vrot.lane.b32.xlu1 %v3359_v44, %s3152_s10 }
 0x79a   : > { %1655 = vrot.lane.b32.xlu1 %v3354_v40, %s3153_s13 }
 0x80c   : > { %v1473_v61 = vpop.xlane.xlu0 %1472 }
 0x80d   : > { %v1480_v62 = vsub.f32 %v1468_v45, %v1473_v61 }
 0x80e   : > { %v1476_v0 = vpop.xlane.xlu1 %1475 }
 0x80f   : > { %v1483_v1 = vmul.f32 1.442695, %v1480_v62  ;;  %v1481_v2 = vsub.f32 %v1469_v49, %v1476_v0 }
 0x811   : > { %3008 = vpow2.f32 %v1483_v1  ;;  %v1485_v3 = vmul.f32 1.442695, %v1481_v2  ;;  %v2575_v2 = vld [vmem:[%s3732_s1 + $0x18] sm:$0xff] }
 0x812   : > { %v1508_v4 = vpop.permute.xlu1 %1507 }
 0x813   : > { %3010 = vpow2.f32 %v1485_v3  ;;  %v1513_v6 = vsel %vm841_vm4, %v1508_v4, 0 }
 0x814   : > { %v1479_v7 = vpop.xlane.xlu0 %1478  ;;  %2782 = vmatpush3.bf16.msra.mxu0 %v1513_v6 }
 0x815   : > { %v1482_v8 = vsub.f32 %v1470_v57, %v1479_v7  ;;  %2793 = vmatprep.subr.bf16.mxu0 %v3143_v37 }
 0x816   : > { %v1604_v17 = vpop.permute.xlu1 %1603 }
 0x817   : > { %v1487_v9 = vmul.f32 1.442695, %v1482_v8  ;;  %v1609_v32 = vsel %vm841_vm4, %v1604_v17, 0 }
 0x819   : > { %3012 = vpow2.f32 %v1487_v9 }
 0x81a   : > { %v1656_v20 = vpop.permute.xlu1 %1655 }
 0x81b   : > { %v3009_v10 = vpop.eup %3008  ;;  %v1661_v38 = vsel %vm634_vm3, %v1656_v20, 0 }
 0x81c   : > { %v1489_v11 = vsel %vm634_vm3, %v3009_v10, 0.0 }
 0x81d   : > { %v3011_v12 = vpop.eup %3010  ;;  %1490 = vadd.xlane.f32.xlu0 %v1489_v11 }
 0x81e   : > { %v1492_v13 = vsel %vm634_vm3, %v3011_v12, 0.0 }
 0x821   : > { %1493 = vadd.xlane.f32.xlu0 %v1492_v13 }
 0x823   : > { %v3013_v14 = vpop.eup %3012 }
 0x824   : > { %v1495_v15 = vsel %vm634_vm3, %v3013_v14, 0.0 }
 0x825   : > { %1496 = vadd.xlane.f32.xlu1 %v1495_v15 }
 0x836   : > { %1653 = vrot.lane.b32.xlu1 %v3354_v40, %s3154_s24 }
 0x837   : > { %1555 = vrot.lane.b32.xlu0 %v3356_v43, %s3152_s10 }
 0x83a   : > { %1703 = vrot.lane.b32.xlu1 %v3356_v43, %s3154_s24 }
 0x83b   : > { %1705 = vrot.lane.b32.xlu0 %v3356_v43, %s3153_s13 }
 0x83f   : > { %1755 = vrot.lane.b32.xlu0 %v3359_v44, %s3153_s13 }
 0x843   : > { %1753 = vrot.lane.b32.xlu0 %v3359_v44, %s3154_s24 }
 0x8aa   : > { %v1491_v18 = vpop.xlane.xlu0 %1490 }
 0x8ab   : > { %3014 = vrcp.f32 %v1491_v18 }
 0x8ae   : > { %v1494_v21 = vpop.xlane.xlu0 %1493 }
 0x8af   : > { %3016 = vrcp.f32 %v1494_v21 }
 0x8b2   : > { %v1556_v22 = vpop.permute.xlu0 %1555  ;;  %v1497_v25 = vpop.xlane.xlu1 %1496 }
 0x8b3   : > { %v1561_v26 = vsel %vm841_vm4, %v1556_v22, 0  ;;  %3018 = vrcp.f32 %v1497_v25 }
 0x8b4   : > { %2788 = vmatpush3.bf16.msra.mxu1 %v1561_v26 }
 0x8b5   : > { %v3015_v27 = vpop.eup %3014  ;;  %2799 = vmatprep.subr.bf16.mxu1 %v3143_v37 }
 0x8b6   : > { %v1501_v29 = vmul.f32 %v3015_v27, %v3009_v10  ;;  %v1706_v36 = vpop.permute.xlu0 %1705  ;;  %v1654_v46 = vpop.permute.xlu1 %1653 }
 0x8b7   : > { %v1711_v42 = vsel %vm634_vm3, %v1706_v36, 0 }
 0x8b8   : > { %v1504_v30 = vpack.c.bf16 %v1501_v29, %v1501_v29 }
 0x8b9   : > { %v3017_v31 = vpop.eup %3016 }
 0x8ba   : > { %v1502_v33 = vmul.f32 %v3017_v31, %v3011_v12  ;;  %2784 = vmatmul.mubr.msk.bf16.vlgmr.msra.gmra.mrb[32].mxu0 %vm634_vm3, %v1504_v30  ;;  %v1756_v45 = vpop.permute.xlu0 %1755  ;;  %v1704_v48 = vpop.permute.xlu1 %1703 }
 0x8bb   : > { %2794 = vmatpush3.bf16.msra.mxu0 %v1609_v32  ;;  %2795 = vmatprep.mubr.msk.bf16.mxu0 %vm3144_vm2, %v3143_v37  ;;  %v1761_v47 = vsel %vm634_vm3, %v1756_v45, 0 }
 0x8bc   : > { %v1505_v34 = vpack.c.bf16 %v1502_v33, %v1502_v33  ;;  %2805 = vmatprep.subr.bf16.mxu0 %v3143_v37 }
 0x8bd   : > { %v3019_v35 = vpop.eup %3018 }
 0x8be   : > { %v1503_v39 = vmul.f32 %v3019_v35, %v3013_v14  ;;  %2790 = vmatmul.mubr.msk.bf16.vlgmr.msra.gmra.mrb[32].mxu1 %vm634_vm3, %v1505_v34  ;;  %v1754_v49 = vpop.permute.xlu0 %1753 }
 0x8bf   : > { %2800 = vmatpush3.bf16.xpose.msra.mxu1 %v1661_v38  ;;  %2801 = vmatprep.mubr.msk.bf16.mxu1 %vm3144_vm2, %v3143_v37 }
 0x8c0   : > { %v1506_v41 = vpack.c.bf16 %v1503_v39, %v1503_v39  ;;  %2811 = vmatprep.subr.bf16.mxu1 %v3143_v37 }
 0x8c2   : > { %2796 = vmatmul.mubr.msk.bf16.vlgmr.msra.gmra.mrb[36].mxu0 %vm634_vm3, %v1506_v41 }
 0x8c3   : > { %2807 = vmatprep.mubr.msk.bf16.mxu0 %vm3144_vm2, %v3143_v37 }
 0x8c4   : > { %2806 = vmatpush3.bf16.xpose.msra.mxu0 %v1711_v42 }
 0x8c5   : > { %2817 = vmatprep.subr.bf16.mxu0 %v3143_v37 }
 0x8c6   : > { %2802 = vmatmul.mubr.msk.bf16.vlgmr.msra.gmra.mrb[36].mxu1 %vm634_vm3, %v1654_v46 }
 0x8c7   : > { %2812 = vmatpush3.bf16.xpose.msra.mxu1 %v1761_v47  ;;  %2813 = vmatprep.mubr.msk.bf16.mxu1 %vm3144_vm2, %v3143_v37 }
 0x8c8   : > { %2823 = vmatprep.subr.bf16.mxu1 %v3143_v37 }
 0x8cb   : > { %2808 = vmatmul.mubr.msk.bf16.vlgmr.msra.gmra.mrb[40].mxu0 %vm634_vm3, %v1704_v48 }
 0x8cc   : > { %2819 = vmatprep.mubr.msk.bf16.mxu0 %vm3144_vm2, %v3143_v37 }
 0x8ce   : > { %2814 = vmatmul.mubr.msk.bf16.vlgmr.msra.gmra.mrb[40].mxu1 %vm634_vm3, %v1754_v49 }
 0x8cf   : > { %2825 = vmatprep.mubr.msk.bf16.mxu1 %vm3144_vm2, %v3143_v37 }
 0x98d   : > { %v3569_v50 = vpop.f32.mrb[32].mxu0 }
 0x98e   : > { %v2785_v51 = vpop.f32.mrb[33].mxu0 }
 0x98f   : > { %v1552_v52 = vpop.f32.mrb[34].mxu0 }
 0x990   : > { %v2786_v54 = vpop.f32.mrb[35].mxu0 }
 0x991   : > { %v3571_v55 = vpop.f32.mrb[32].mxu1 }
 0x992   : > { %v2958_v56 = vpack.i.bf16 %v3571_v55, %v3569_v50  ;;  %v2791_v57 = vpop.f32.mrb[33].mxu1 }
 0x993   : > { %v1600_v59 = vpop.f32.mrb[34].mxu1 }
 0x994   : > { %v2792_v61 = vpop.f32.mrb[35].mxu1 }
 0x995   : > { %v1645_v62 = vpop.f32.mrb[36].mxu0  ;;  %v2970_v61 = vld [vmem:[%s3316_s18] sm:$0xff]  }
 0x996   : > { %v2797_v0 = vpop.f32.mrb[37].mxu0 }
 0x997   : > { %v1648_v1 = vpop.f32.mrb[38].mxu0 }
 0x998   : > { %v2798_v3 = vpop.f32.mrb[39].mxu0 }
 0x999   : > { %v1697_v4 = vpop.f32.mrb[36].mxu1 }
 0x99a   : > { %v1698_v6 = vadd.f32 %v2575_v2, %v1697_v4  ;;  %v2803_v7 = vpop.f32.mrb[37].mxu1 }
 0x99b   : > { %v1700_v8 = vpop.f32.mrb[38].mxu1 }
 0x99c   : > { %v2804_v9 = vpop.f32.mrb[39].mxu1  ;;  %v1803_v10 = vadd.f32 %v3385_v53, %v1698_v6 }
 0x99e   : > { %v1747_v11 = vpop.f32.mrb[40].mxu0  ;;  %v1806_v12 = vsel %vm634_vm3, %v1803_v10, -inf }
 0x99f   : > { %v1748_v13 = vadd.f32 %v2575_v2, %v1747_v11  ;;  %v2809_v14 = vpop.f32.mrb[41].mxu0  ;;  %1807 = vmax.xlane.f32.xlu1 %v1806_v12 }
 0x9a0   : > { %v1750_v15 = vpop.f32.mrb[42].mxu0 }
 0x9a1   : > { %v2810_v17 = vpop.f32.mrb[43].mxu0  ;;  %v1797_v18 = vpop.f32.mrb[40].mxu1  ;;  %v1804_v20 = vadd.f32 %v3388_v58, %v1748_v13 }
 0x9a2   : > { %v1798_v21 = vadd.f32 %v2575_v2, %v1797_v18  ;;  %v2815_v22 = vpop.f32.mrb[41].mxu1 }
 0x9a3   : > { %v1800_v25 = vpop.f32.mrb[42].mxu1  ;;  %v1809_v26 = vsel %vm634_vm3, %v1804_v20, -inf }
 0x9a4   : > { %1810 = vmax.xlane.f32.xlu0 %v1809_v26  ;;  %v2816_v27 = vpop.f32.mrb[43].mxu1  ;;  %v1805_v53 = vadd.f32 %v3395_v5, %v1798_v21 }
 0x9a6   : > { %v1812_v29 = vsel %vm634_vm3, %v1805_v53, -inf }
 0x9a8   : > { %1813 = vmax.xlane.f32.xlu0 %v1812_v29 }
 0x9b0   : > { %1842 = vrot.lane.b32.xlu1 %v3354_v40, %s3155_s11 }
 0xa2c   : > { %v1808_v30 = vpop.xlane.xlu1 %1807 }
 0xa2d   : > { %v1815_v31 = vsub.f32 %v1803_v10, %v1808_v30 }
 0xa2f   : > { %v1818_v32 = vmul.f32 1.442695, %v1815_v31 }
 0xa30   : > { %v1843_v58 = vpop.permute.xlu1 %1842 }
 0xa31   : > { %3020 = vpow2.f32 %v1818_v32  ;;  %v1848_v33 = vsel %vm841_vm4, %v1843_v58, 0  ;;  %v1811_v34 = vpop.xlane.xlu0 %1810 }
 0xa32   : > { %v1816_v35 = vsub.f32 %v1804_v20, %v1811_v34  ;;  %2818 = vmatpush3.bf16.msra.mxu0 %v1848_v33 }
 0xa33   : > { %2829 = vmatprep.subr.bf16.mxu0 %v3143_v37 }
 0xa34   : > { %v1820_v5 = vmul.f32 1.442695, %v1816_v35 }
 0xa35   : > { %v1814_v36 = vpop.xlane.xlu0 %1813 }
 0xa36   : > { %3022 = vpow2.f32 %v1820_v5  ;;  %v1817_v38 = vsub.f32 %v1805_v53, %v1814_v36 }
 0xa38   : > { %v1822_v39 = vmul.f32 1.442695, %v1817_v38 }
 0xa3a   : > { %3024 = vpow2.f32 %v1822_v39  ;;  %v3038_v39 = vld [vmem:[#allocation2 + $0x10] sm:$0xff] }
 0xa3b   : > { %v3021_v41 = vpop.eup %3020 }
 0xa3c   : > { %v1824_v40 = vsel %vm634_vm3, %v3021_v41, 0.0 }
 0xa3d   : > { %1825 = vadd.xlane.f32.xlu0 %v1824_v40 }
 0xa40   : > { %v3023_v42 = vpop.eup %3022 }
 0xa41   : > { %v1827_v45 = vsel %vm634_vm3, %v3023_v42, 0.0 }
 0xa42   : > { %1828 = vadd.xlane.f32.xlu1 %v1827_v45 }
 0xa44   : > { %v3025_v46 = vpop.eup %3024 }
 0xa45   : > { %v1830_v47 = vsel %vm634_vm3, %v3025_v46, 0.0 }
 0xa46   : > { %1831 = vadd.xlane.f32.xlu0 %v1830_v47 }
 0xa53   : > { %1938 = vrot.lane.b32.xlu1 %v3359_v44, %s3155_s11 }
 0xa57   : > { %2954 = vrot.lane.b32.xlu1 %v2953_v24, %s3156_s21 }
 0xa5b   : > { %1993 = vrot.lane.b32.xlu1 %v3510_v28, %s3156_s21 }
 0xa5c   : > { %1890 = vrot.lane.b32.xlu0 %v3356_v43, %s3155_s11 }
 0xa5f   : > { %2005 = vrot.lane.b32.xlu1 %v1645_v62, %s3157_s22  ;;  %v2971_v62 = vld [vmem:[%s3316_s18 + $0x8] sm:$0xff]  }
 0xa60   : > { %2959 = vrot.lane.b32.xlu0 %v2958_v56, %s3157_s22 }
 0xaca   : > { %v1826_v48 = vpop.xlane.xlu0 %1825 }
 0xacb   : > { %3026 = vrcp.f32 %v1826_v48 }
 0xacf   : > { %v1829_v49 = vpop.xlane.xlu1 %1828 }
 0xad0   : > { %3028 = vrcp.f32 %v1829_v49 }
 0xad3   : > { %v1832_v44 = vpop.xlane.xlu0 %1831  ;;  %v1939_v23 = vpop.permute.xlu1 %1938 }
 0xad4   : > { %3030 = vrcp.f32 %v1832_v44  ;;  %v1944_v50 = vsel %vm841_vm4, %v1939_v23, 0 }
 0xad5   : > { %v3027_v51 = vpop.eup %3026 }
 0xad6   : > { %v1836_v19 = vmul.f32 %v3027_v51, %v3021_v41 }
 0xad7   : > { %v1891_v24 = vpop.permute.xlu0 %1890  ;;  %v2955_v13 = vpop.permute.xlu1 %2954 }
 0xad8   : > { %v1896_v28 = vsel %vm841_vm4, %v1891_v24, 0  ;;  %v1839_v43 = vpack.c.bf16 %v1836_v19, %v1836_v19  ;;  %v2957_v17 = vunpack.i.h.bf16 %v2955_v13  ;;  %v2956_v18 = vunpack.i.l.bf16 %v2955_v13  ;;  %v2972_v24 = vld [vmem:[%s3325_s15] sm:$0xff]   ;;  %v2976_v13 = vld [vmem:[%s3331_s20 + $0x10] sm:$0xff]  }
 0xad9   : > { %2824 = vmatpush3.bf16.msra.mxu1 %v1896_v28  ;;  %v2973_v28 = vld [vmem:[%s3325_s15 + $0x8] sm:$0xff]  }
 0xada   : > { %v3029_v52 = vpop.eup %3028  ;;  %2820 = vmatmul.mubr.msk.bf16.vlgmr.msra.gmra.mrb[44].mxu0 %vm634_vm3, %v1839_v43  ;;  %2835 = vmatprep.subr.bf16.mxu1 %v2970_v61  ;;  %v2023_v25 = vsel %vm634_vm3, %v3446_v63, %v2957_v17  ;;  %v2022_v27 = vsel %vm634_vm3, %v3444_v60, %v2956_v18  ;;  %v2974_v43 = vld [vmem:[%s3331_s20] sm:$0xff]  }
 0xadb   : > { %v1837_v54 = vmul.f32 %v3029_v52, %v3023_v42  ;;  %2830 = vmatpush3.bf16.msra.mxu0 %v1944_v50  ;;  %2831 = vmatprep.mubr.msk.bf16.mxu0 %vm3144_vm2, %v3143_v37  ;;  %v1994_v14 = vpop.permute.xlu1 %1993  ;;  %v2960_v15 = vpop.permute.xlu0 %2959  ;;  %v2975_v52 = vld [vmem:[%s3331_s20 + $0x8] sm:$0xff]  }
 0xadc   : > { %v2962_v20 = vunpack.i.h.bf16 %v2960_v15  ;;  %v2961_v21 = vunpack.i.l.bf16 %v2960_v15  ;;  %v2024_v53 = vsel %vm634_vm3, %v3453_v16, %v1994_v14  ;;  %v3039_v16 = vld [vmem:[#allocation2] sm:$0xff]  ;;  %2843 = vmatprep.subr.bf16.mxu0 %v2972_v24  ;;  %v2977_v14 = vld [vmem:[%s3331_s20 + $0x18] sm:$0xff]  }
 0xadd   : > { %v1840_v55 = vpack.c.bf16 %v1837_v54, %v1837_v54 }
 0xade   : > { %v3031_v56 = vpop.eup %3030  ;;  %v2026_v31 = vsel %vm2025_vm5, %v2022_v27, %v2961_v21  ;;  %v2027_v32 = vsel %vm2025_vm5, %v2023_v25, %v2962_v20 }
 0xadf   : > { %v1838_v57 = vmul.f32 %v3031_v56, %v3025_v46  ;;  %2826 = vmatmul.mubr.msk.bf16.vlgmr.msra.gmra.mrb[44].mxu1 %vm634_vm3, %v1840_v55  ;;  %v2006_v22 = vpop.permute.xlu1 %2005  ;;  %v3040_v46 = vld [vmem:[#allocation2 + $0x8] sm:$0xff] }
 0xae0   : > { %2836 = vmatpush3.bf16.msra.mxu1 %v2970_v61  ;;  %v2028_v58 = vsel %vm2025_vm5, %v2024_v53, %v2006_v22 }
 0xae1   : > { %v1841_v59 = vpack.c.bf16 %v1838_v57, %v1838_v57  ;;  %2837 = vmatprep.subr.bf16.mxu1 %v2971_v62 }
 0xae3   : > { %2832 = vmatmul.mubr.msk.bf16.vlgmr.msra.gmra.mrb[48].mxu0 %vm634_vm3, %v1841_v59 }
 0xae4   : > { %2838 = vmatpush3.bf16.msra.mxu1 %v2971_v62  ;;  %2844 = vmatpush3.bf16.msra.mxu0 %v2972_v24 }
 0xae5   : > { %2845 = vmatprep.subr.bf16.mxu0 %v2973_v28  ;;  %2851 = vmatprep.subr.bf16.mxu1 %v2974_v43 }
 0xae8   : > { %2846 = vmatpush3.bf16.msra.mxu0 %v2973_v28 }
 0xbad   : > { %v1884_v0 = vpop.f32.mrb[44].mxu0 }
 0xbae   : > { %v2821_v1 = vpop.f32.mrb[45].mxu0 }
 0xbaf   : > { %v1887_v2 = vpop.f32.mrb[46].mxu0 }
 0xbb0   : > { %v2822_v3 = vpop.f32.mrb[47].mxu0 }
 0xbb2   : > { %v1932_v4 = vpop.f32.mrb[44].mxu1 }
 0xbb3   : > { %v2963_v37 = vpack.i.bf16 %v1932_v4, %v1884_v0  ;;  %v2827_v6 = vpop.f32.mrb[45].mxu1  ;;  %v2586_v4 = vld [vmem:[%s486_s23] ss:$0 sm:$0xff] }
 0xbb4   : > { %v1935_v7 = vpop.f32.mrb[46].mxu1 }
 0xbb5   : > { %v2828_v8 = vpop.f32.mrb[47].mxu1  ;;  %2964 = vrot.lane.b32.xlu0 %v2963_v37, %s3158_s28 }
 0xbb6   : > { %v1980_v9 = vpop.f32.mrb[48].mxu0 }
 0xbb7   : > { %2017 = vrot.lane.b32.xlu1 %v1980_v9, %s3158_s28  ;;  %v2833_v10 = vpop.f32.mrb[49].mxu0 }
 0xbb8   : > { %v1983_v11 = vpop.f32.mrb[50].mxu0 }
 0xbb9   : > { %v2834_v12 = vpop.f32.mrb[51].mxu0 }
 0xc27   : > { %v2965_v26 = vpop.permute.xlu0 %2964 }
 0xc28   : > { %v2967_v29 = vunpack.i.h.bf16 %v2965_v26  ;;  %v2966_v30 = vunpack.i.l.bf16 %v2965_v26 }
 0xc29   : > { %v2018_v33 = vpop.permute.xlu1 %2017 }
 0xc2a   : > { %v2030_v34 = vsel %vm2029_vm6, %v2026_v31, %v2966_v30  ;;  %v2031_v35 = vsel %vm2029_vm6, %v2027_v32, %v2967_v29  ;;  %v2032_v5 = vsel %vm2029_vm6, %v2028_v58, %v2018_v33 }
 0xc2b   : > { %v2033_v36 = vpack.c.bf16 %v2031_v35, %v2030_v34  ;;  %v2034_v38 = vpack.c.bf16 %v2032_v5, %v2032_v5 }
 0xc2d   : > { %2839 = vmatprep.mubr.msk.bf16.mxu1 %vm520_vm1, %v2033_v36 }
 0xc2e   : > { %2840 = vmatmul.mubr.msk.bf16.vlgmr.msra.gmra.mrb[48].mxu1 %vm520_vm1, %v2034_v38 }
 0xc2f   : > { %2852 = vmatpush3.bf16.msra.mxu1 %v2974_v43 }
 0xc30   : > { %2853 = vmatprep.subr.bf16.mxu1 %v2975_v52 }
 0xc33   : > { %2854 = vmatpush3.bf16.msra.mxu1 %v2975_v52 }
 0xc34   : > { %2855 = vmatprep.subr.bf16.mxu1 %v2976_v13 }
 0xc37   : > { %2856 = vmatpush3.bf16.msra.mxu1 %v2976_v13 }
 0xc38   : > { %2857 = vmatprep.subr.bf16.mxu1 %v2977_v14 }
 0xc3b   : > { %2858 = vmatpush3.bf16.msra.mxu1 %v2977_v14 }
 0xd01   : > { %v2841_v63 = vpop.f32.mrb[48].mxu1 }
 0xd02   : > { %v2091_v60 = vpop.f32.mrb[49].mxu1  ;;  %v3619_v41 = vadd.f32 %v3038_v39, %v2841_v63 }
 0xd03   : > { %v3621_v40 = vadd.f32 %v3039_v16, %v2091_v60  ;;  %v2842_v42 = vpop.f32.mrb[50].mxu1 }
 0xd04   : > { %v2094_v45 = vpop.f32.mrb[51].mxu1  ;;  %v2111_v51 = vmul.f32 %v3619_v41, %v3619_v41 }
 0xd05   : > { %v3623_v47 = vadd.f32 %v3040_v46, %v2094_v45  ;;  %v2109_v48 = vmul.f32 %v3621_v40, %v3621_v40 }
 0xd06   : > { %v2118_v23 = vsel %vm520_vm1, %v2111_v51, 0.0 }
 0xd07   : > { %v2112_v49 = vsel %vm520_vm1, %v2109_v48, 0.0  ;;  %v2110_v44 = vmul.f32 %v3623_v47, %v3623_v47 }
 0xd08   : > { %2113 = vadd.xlane.f32.xlu0 %v2112_v49  ;;  %v2598_v49 = vld [vmem:[%s3740_s9] ss:$0 sm:$0xff] (!%p2597_p2) }
 0xd09   : > { %v2115_v19 = vsel %vm520_vm1, %v2110_v44, 0.0 }
 0xd0a   : > { %2116 = vadd.xlane.f32.xlu1 %v2115_v19 }
 0xd0c   : > { %2119 = vadd.xlane.f32.xlu0 %v2118_v23 }
 0xd95   : > { %v2114_v50 = vpop.xlane.xlu0 %2113 }
 0xd96   : > { %v2121_v54 = vmul.f32 0.03125, %v2114_v50 }
 0xd97   : > { %v2117_v55 = vpop.xlane.xlu1 %2116 }
 0xd98   : > { %v2124_v56 = vadd.f32 1e-06, %v2121_v54  ;;  %v2122_v57 = vmul.f32 0.03125, %v2117_v55 }
 0xd99   : > { %v2120_v59 = vpop.xlane.xlu0 %2119 }
 0xd9a   : > { %3032 = vrsqrt.f32 %v2124_v56  ;;  %v2125_v61 = vadd.f32 1e-06, %v2122_v57  ;;  %v2123_v62 = vmul.f32 0.03125, %v2120_v59 }
 0xd9c   : > { %3034 = vrsqrt.f32 %v2125_v61  ;;  %v2126_v0 = vadd.f32 1e-06, %v2123_v62 }
 0xd9e   : > { %3036 = vrsqrt.f32 %v2126_v0 }
 0xda4   : > { %v3033_v1 = vpop.eup %3032 }
 0xda5   : > { %v2130_v2 = vmul.f32 %v3033_v1, %v3621_v40 }
 0xda6   : > { %v3035_v3 = vpop.eup %3034 }
 0xda7   : > { %v2131_v37 = vmul.f32 %v3035_v3, %v3623_v47  ;;  %v2139_v8 = vmul.f32 %v2586_v4, %v2130_v2 }
 0xda8   : > { %v3037_v6 = vpop.eup %3036 }
 0xda9   : > { %v2132_v7 = vmul.f32 %v3037_v6, %v3619_v41  ;;  %v2140_v9 = vmul.f32 %v2586_v4, %v2131_v37 }
 0xdab   : > { %v2142_v10 = vpack.c.bf16 %v2140_v9, %v2139_v8  ;;  %v2141_v11 = vmul.f32 %v2586_v4, %v2132_v7 }
 0xdad   : > { %2847 = vmatprep.mubr.msk.bf16.mxu0 %vm520_vm1, %v2142_v10  ;;  %v2143_v12 = vpack.c.bf16 %v2141_v11, %v2141_v11 }
 0xdaf   : > { %2848 = vmatmul.mubr.msk.bf16.vlgmr.msra.gmra.mrb[52].mxu0 %vm520_vm1, %v2143_v12 }
 0xe82   : > { %v2849_v15 = vpop.f32.mrb[52].mxu0 }
 0xe83   : > { %v2200_v17 = vpop.f32.mrb[53].mxu0  ;;  %v2216_v20 = vmax.f32 %v2849_v15, 0.0 }
 0xe84   : > { %v2850_v18 = vpop.f32.mrb[54].mxu0  ;;  %v2214_v22 = vmax.f32 %v2200_v17, 0.0 }
 0xe85   : > { %v2203_v21 = vpop.f32.mrb[55].mxu0  ;;  %v2218_v27 = vpack.c.bf16 %v2216_v20, %v2216_v20 }
 0xe86   : > { %v2215_v25 = vmax.f32 %v2203_v21, 0.0 }
 0xe88   : > { %v2217_v26 = vpack.c.bf16 %v2215_v25, %v2214_v22 }
 0xe8a   : > { %2859 = vmatprep.mubr.msk.bf16.mxu1 %vm2251_vm7, %v2217_v26 }
 0xe8b   : > { %2860 = vmatmul.mubr.msk.bf16.vlgmr.msra.gmra.mrb[52].mxu1 %vm2251_vm7, %v2218_v27 }
 0xf5e   : > { %v2861_v53 = vpop.f32.mrb[52].mxu1  ;;  %2315 = sbr.rel (%p2597_p2) target bundleno = 4109 (0x100d), region = 68 }
 0xf5f   : > { %v2308_v29 = vadd.f32 %v2861_v53, %v3619_v41  ;;  %v2292_v30 = vpop.f32.mrb[53].mxu1 }
 0xf60   : > { %v2306_v31 = vadd.f32 %v2292_v30, %v3621_v40  ;;  %v2862_v32 = vpop.f32.mrb[54].mxu1 }
 0xf61   : > { %2311 = vst.msk [vmem:[#allocation2 + $0x10] sm:$0xff] %vm520_vm1, %v2308_v29  ;;  %v2295_v58 = vpop.f32.mrb[55].mxu1  ;;  %v2319_v35 = vmul.f32 (!%p2597_p2), %v2308_v29, %v2308_v29 }
 0xf62   : > { %2309 = vst.msk [vmem:[#allocation2] sm:$0xff] %vm520_vm1, %v2306_v31  ;;  %v2307_v33 = vadd.f32 %v2295_v58, %v3623_v47  ;;  %v2317_v34 = vmul.f32 (!%p2597_p2), %v2306_v31, %v2306_v31 }
 0xf63   : > { %v2326_v38 = vsel (!%p2597_p2), %vm520_vm1, %v2319_v35, 0.0 }
 0xf64   : > { %2310 = vst.msk [vmem:[#allocation2 + $0x8] sm:$0xff] %vm520_vm1, %v2307_v33  ;;  %v2318_v5 = vmul.f32 (!%p2597_p2), %v2307_v33, %v2307_v33  ;;  %v2320_v36 = vsel (!%p2597_p2), %vm520_vm1, %v2317_v34, 0.0  ;;  %2327 = vadd.xlane.f32.xlu1 (!%p2597_p2), %v2326_v38 }
 0xf65   : > { %2321 = vadd.xlane.f32.xlu0 %v2320_v36 }
 0xf66   : > { %v2323_v63 = vsel %vm520_vm1, %v2318_v5, 0.0 }
 0xf69   : > { %2324 = vadd.xlane.f32.xlu0 %v2323_v63 }
 0xff1   : > { %v2328_v39 = vpop.xlane.xlu1 %2327 }
 0xff2   : > { %v2322_v60 = vpop.xlane.xlu0 %2321  ;;  %v2331_v16 = vmul.f32 0.03125, %v2328_v39 }
 0xff3   : > { %v2329_v41 = vmul.f32 0.03125, %v2322_v60 }
 0xff4   : > { %v2334_v42 = vadd.f32 1e-06, %v2331_v16 }
 0xff5   : > { %v2332_v40 = vadd.f32 1e-06, %v2329_v41 }
 0xff6   : > { %v2325_v45 = vpop.xlane.xlu0 %2324 }
 0xff7   : > { %3041 = vrsqrt.f32 %v2332_v40  ;;  %v2330_v46 = vmul.f32 0.03125, %v2325_v45 }
 0xff8   : > { %3043 = vrsqrt.f32 %v2334_v42 }
 0xff9   : > { %v2333_v47 = vadd.f32 1e-06, %v2330_v46 }
 0xffb   : > { %3045 = vrsqrt.f32 %v2333_v47 }
0x1001   : > { %v3042_v48 = vpop.eup %3041 }
0x1002   : > { %v3044_v44 = vpop.eup %3043  ;;  %v2338_v51 = vmul.f32 %v3042_v48, %v2306_v31 }
0x1003   : > { %v2340_v19 = vmul.f32 %v3044_v44, %v2308_v29 }
0x1004   : > { %v2347_v23 = vmul.f32 %v2598_v49, %v2338_v51 }
0x1005   : > { %v3046_v24 = vpop.eup %3045  ;;  %v2349_v28 = vmul.f32 %v2598_v49, %v2340_v19 }
0x1006   : > { %v2609_v43 = vpack.c.bf16 %v2347_v23, %v2347_v23  ;;  %v2339_v52 = vmul.f32 %v3046_v24, %v2307_v33 }
0x1007   : > { %v2611_v50 = vpack.c.bf16 %v2349_v28, %v2349_v28 }
0x1008   : > { %2364 = vst.msk [vmem:[%s3333_s27] sm:$0xf] %vm2363_vm8, %v2609_v43  ;;  %v2348_v54 = vmul.f32 %v2598_v49, %v2339_v52 }
0x1009   : > { %2366 = vst.msk [vmem:[%s3333_s27 + $0x8] sm:$0xf] %vm2363_vm8, %v2611_v50 }
0x100a   : > { %v2610_v55 = vpack.c.bf16 %v2348_v54, %v2348_v54 }
0x100c   : > { %2365 = vst.msk [vmem:[%s3333_s27 + $0x4] sm:$0xf] %vm2363_vm8, %v2610_v55 }
0x100d PF: > { %s2612_s20 = smul.u32 192, %s3129_s17  ;;  %s2381_s29 = sshll.u32 %s3333_s27, 4  ;;  %s3673_s29 = int_to_ptr.vmem [resolvable:$true] %s2381_s29 }
0x100e   : > { %s3773_s2 = sld [smem:[#allocation18_spill]]  ;;  %s3774_s13 = sand.u32 1, %s3117_s14  }
0x100f   : > { %s3677_s24 = scalar_lea.sflag [#allocation4], %s3774_s13  ;;  %s3047_s25 = scalar_lea.vmem %s3673_s29, 192 }
0x1010   : > { %p3048_p4 = scmp.ne.s32.totalorder %s3673_s29, %s3047_s25  ;;  %s3159_s17 = smov [#allocation3]  }
0x1011   : > { %s3051_s27 = sshll.u32 %s3159_s17, 4  ;;  %s3052_s27 = int_to_ptr.vmem [resolvable:$false] %s3051_s27 }
0x1012   : > { %p3049_p5 = pnand %p3048_p4, %p3265_p3  ;;  %s3053_s12 = scalar_lea.vmem %s3052_s27, 384 }
0x1013   : > { %p3054_p7 = scmp.lt.s32.totalorder %s3673_s29, %s3052_s27  ;;  %p3055_p8 = scmp.lt.s32.totalorder %s3053_s12, %s3047_s25 }
0x1014   : > { %s3671_s10 = scalar_lea.hbm %s3773_s2, %s2612_s20  ;;  %p3050_p6 = pneg %p3049_p5 }
0x1015   : > { %p3056_p10 = por %p3055_p8, %p3054_p7 }
0x1017   : > { %p3057_p11 = pnand %p3056_p10, %p3050_p6 }
0x1019   : > { %3060 = shalt.err (!%p3057_p11)
}
0x101a   : > { %s3061_s11 = scalar_lea.hbm %s3671_s10, 192  ;;  %s3065_s28 = scalar_lea.hbm %s3773_s2, 384 }
0x101b   : > { %p3062_p12 = scmp.ne.s32.totalorder %s3671_s10, %s3061_s11  ;;  %p3066_p1 = scmp.lt.u32.totalorder %s3671_s10, %s3773_s2 }
0x101c   : > { %p3067_p2 = scmp.lt.u32.totalorder %s3065_s28, %s3061_s11  ;;  %p3069_p5 = scmp.lt.u32.totalorder %s3061_s11, %s3671_s10 }
0x101d   : > { %p3063_p13 = pnand %p3062_p12, %p3265_p3 }
0x101e   : > { %p3068_p4 = por %p3067_p2, %p3066_p1 }
0x101f   : > { %p3064_p0 = pneg %p3063_p13 }
0x1020   : > { %p3070_p6 = por %p3069_p5, %p3068_p4 }
0x1022   : > { %p3071_p7 = pnand %p3070_p6, %p3064_p0 }
0x1024   : > { %3074 = shalt.err (!%p3071_p7)
}
0x1025   : > { %s3160_s16 = smov 4  }
0x1026   : > { %2865 = dma.vmem_to_hbm [thread:$0]  (%p3265_p3), %s3673_s29, 192, %s3671_s10, %s3677_s24, %s3146_s30, %s3146_s30, %s3160_s16  }
0x1027 PF: > { %s3775_s19 = sld [smem:[#allocation10_spill]]  ;;  %s3776_s20 = sld [smem:[#allocation6_spill]] }
0x102d   : > { %p2871_p8 = scmp.ge.s32.totalorder %s3775_s19, 2  ;;  %s2396_s0 = sand.u32 1, %s3776_s20  }
0x102e   : > { %s2397_s13 = scalar_lea.sflag [#allocation4], %s2396_s0 }
0x102f   : > { %p2868_p10 = pnand %p2871_p8, %p3275_p9 }
0x1031   : > { %3108 = dma.done.wait (!%p2868_p10), %s2397_s13, 192  }
0x1032   : > { %3110 = vsyncadd (!%p2868_p10), %s2397_s13, 4294967104  ;;  %s23_s20 = sadd.s32 1, %s3775_s19   ;;  %s3778_s23 = sld [smem:[#allocation7_spill]] }
0x1033   : > { %p20_p11 = scmp.ge.s32.totalorder %s23_s20, 6   ;;  %s3779_s15 = sld [smem:[#allocation15_spill]] }
0x1034   : > { %s3780_s16 = sld [smem:[#allocation8_spill]]  ;;  %s3781_s17 = sld [smem:[#allocation9_spill]] }
0x1035   : > { %s3782_s18 = sld [smem:[#allocation11_spill]]  ;;  %s3783_s19 = sld [smem:[#allocation13_spill]] }
0x1036   : > { %s3784_s13 = smov %s3117_s14  ;;  %22 = sbr.rel (!%p20_p11) target bundleno = 9 (0x9), region = 127 }
0x1038   : > { %s3785_s14 = smov %s3778_s23 }
0x103d   :  { %2402 = vsyncpa [#allocation4], 1 }
0x103e   :  { %2404 = vsyncpa [#allocation4 + $0x1], 1 }

</bundles_post_ra>
